<compile_context>
chip_gen: v7x
topology: tpu7x:2x2x1
jax: 0.10.0
libtpu: 0.0.40
codegen_flags: <defaults>
</compile_context>

<pallas_src>
import functools

import jax
import jax.numpy as jnp
from jax.experimental import pallas as pl
from jax.experimental.pallas import tpu as pltpu

LANE = 128


def _round_up(x, m):
    return (x + m - 1) // m * m


# ----------------------------------------------------------------------------
# Pallas kernel: the serial recurrence only.
# ----------------------------------------------------------------------------
def _lstm_recurrence_kernel(xp_ref, whh_ref, h_all_ref, h_sc, c_sc, *,
                            t_chunk, hidden_pad, unroll):
    """One grid step = `t_chunk` timesteps of the recurrence for one batch shard.

    xp_ref   : (t_chunk, Bs, 4*Hp)  precomputed x @ W_ih^T + bias (gate-padded),
                                    streamed in the matmul dtype
    whh_ref  : (Hp, 4*Hp)           recurrent weight (gate-padded), matmul dtype
    h_all_ref: (t_chunk, Bs, Hp)    lane-dense hidden-state sequence output
    h_sc/c_sc: (Bs, Hp) f32         state, persists across time chunks
    """
    # Time axis restarts (program_id(1) == 0) whenever a new batch shard begins.
    @pl.when(pl.program_id(1) == 0)
    def _():
        h_sc[...] = jnp.zeros_like(h_sc)
        c_sc[...] = jnp.zeros_like(c_sc)

    Hp = hidden_pad
    matmul_dtype = whh_ref.dtype

    def step(t, carry):
        h_prev = h_sc[...]                                           # (Bs, Hp) f32
        c_prev = c_sc[...]

        # The only matmul on the serial critical path; f32 MXU accumulation.
        gates = jnp.dot(h_prev.astype(matmul_dtype), whh_ref[...],
                        preferred_element_type=jnp.float32)
        gates = gates + xp_ref[t].astype(jnp.float32)                # (Bs, 4*Hp) f32

        # Gate blocks are padded to 128-lane boundaries -> lane-aligned slices.
        i_g = jax.nn.sigmoid(gates[:, 0 * Hp:1 * Hp])
        f_g = jax.nn.sigmoid(gates[:, 1 * Hp:2 * Hp])
        g_g = jnp.tanh(gates[:, 2 * Hp:3 * Hp])
        o_g = jax.nn.sigmoid(gates[:, 3 * Hp:4 * Hp])

        c_new = f_g * c_prev + i_g * g_g
        h_new = o_g * jnp.tanh(c_new)

        c_sc[...] = c_new
        h_sc[...] = h_new
        h_all_ref[t] = h_new.astype(h_all_ref.dtype)                 # lane-dense store
        return carry

    # Bounded partial unroll: LLO visibility without spilling the 64-vreg file.
    jax.lax.fori_loop(0, t_chunk, step, 0, unroll=unroll)


# ----------------------------------------------------------------------------
# Weight packing: transpose + per-gate padding to lane-aligned blocks.
# ----------------------------------------------------------------------------
def _pack_gate_weight(w, H, Hp):
    """PyTorch-layout (4H, K) weight -> (K, 4*Hp) transposed, gate-padded."""
    K = w.shape[1]
    out = jnp.zeros((K, 4 * Hp), jnp.float32)
    for k in range(4):
        out = out.at[:, k * Hp:k * Hp + H].set(
            w[k * H:(k + 1) * H, :].T.astype(jnp.float32))
    return out


def _pack_gate_bias(b, H, Hp):
    out = jnp.zeros((4 * Hp,), jnp.float32)
    for k in range(4):
        out = out.at[k * Hp:k * Hp + H].set(b[k * H:(k + 1) * H].astype(jnp.float32))
    return out


# ----------------------------------------------------------------------------
# Wrapper: batch_first (B, T, I) -> (B, T, O), matching the PyTorch module.
# ----------------------------------------------------------------------------
def vanilla_lstm_forward(x, params, *, t_chunk=None, matmul_dtype=jnp.bfloat16,
                         batch_shards=1):
    """Forward pass of nn.LSTM(batch_first=True) + nn.Linear.

    matmul_dtype : MXU-operand / streaming dtype. bf16 by default (v5e's MXU is
                   bf16-only, 4-8x the f32 rate on v6e/v7x); f32 for exact checks.
                   Accumulation, gate math and the c/h state are always f32.
    batch_shards : size of a leading "parallel" grid axis (v7x megacore). Requires
                   (B // batch_shards) % 8 == 0 when > 1.
    """
    w_ih, w_hh, b_ih, b_hh, w_fc, b_fc = (
        params["w_ih"], params["w_hh"], params["b_ih"], params["b_hh"],
        params["w_fc"], params["b_fc"])

    B, T, I = x.shape
    H = w_hh.shape[1]
    Hp = _round_up(H, LANE)                         # lane-aligned gate blocks

    assert B % batch_shards == 0, "batch_shards must divide B"
    Bs = B // batch_shards
    assert batch_shards == 1 or Bs % 8 == 0, \
        "batch shards must be sublane-aligned (multiple of 8 rows per shard)"

    # ---- time chunking ------------------------------------------------------
    if t_chunk is None:
        t_chunk = T if T <= 64 else 32      # amortize ~0.35us/grid-step overhead
    t_chunk = max(1, min(t_chunk, T))
    Tp = _round_up(T, t_chunk)
    n_chunks = Tp // t_chunk
    unroll = t_chunk if t_chunk <= 8 else 8  # bounded partial unroll

    # ---- one-time weight packing -------------------------------------------
    wih_p = _pack_gate_weight(w_ih, H, Hp)                            # (I, 4Hp)
    whh_p = _pack_gate_weight(w_hh, H, Hp)                            # (H, 4Hp)
    whh_p = jnp.pad(whh_p, ((0, Hp - H), (0, 0))).astype(matmul_dtype)  # (Hp, 4Hp)
    bias_p = _pack_gate_bias(b_ih + b_hh, H, Hp)                      # (4Hp,)
    wfc_p = jnp.pad(jnp.transpose(w_fc).astype(jnp.float32),
                    ((0, Hp - H), (0, 0)))                            # (Hp, O)

    # ---- input projection for ALL timesteps: one big GEMM (no recurrence) ---
    x_tm = jnp.transpose(x, (1, 0, 2))                                # (T, B, I)
    x_proj = jnp.einsum(
        "tbi,ig->tbg",
        x_tm.astype(matmul_dtype), wih_p.astype(matmul_dtype),
        preferred_element_type=jnp.float32) + bias_p                  # (T, B, 4Hp) f32
    # Stream into the kernel in matmul dtype: halves the dominant HBM read (bf16).
    x_proj = x_proj.astype(matmul_dtype)
    if Tp != T:
        # Padded steps run the recurrence on zero inputs; only h_all[:T] is consumed.
        # Do NOT expose the final (h, c) scratch without masking these steps.
        x_proj = jnp.pad(x_proj, ((0, Tp - T), (0, 0), (0, 0)))

    kernel = functools.partial(_lstm_recurrence_kernel, t_chunk=t_chunk,
                               hidden_pad=Hp, unroll=unroll)

    # ---- explicit VMEM budget (double-buffered streams + resident W_hh/state)
    msz = jnp.dtype(matmul_dtype).itemsize
    vmem_bytes = (2 * t_chunk * Bs * 4 * Hp * msz     # x_proj double buffer
                  + 2 * t_chunk * Bs * Hp * msz       # h_all double buffer
                  + 1 * Hp * 4 * Hp * msz             # W_hh (single buffer)
                  + 2 * Bs * Hp * 4)                  # h/c state (f32)
    vmem_limit = int(min(64 * 2**20, max(32 * 2**20, 2 * vmem_bytes)))  # v7x-safe cap

    out_shape = jax.ShapeDtypeStruct((Tp, B, Hp), matmul_dtype)
    xp_spec = pl.BlockSpec((t_chunk, Bs, 4 * Hp), lambda b, c: (c, b, 0))
    out_spec = pl.BlockSpec((t_chunk, Bs, Hp), lambda b, c: (c, b, 0))
    compiler_params = pltpu.CompilerParams(
        dimension_semantics=("parallel", "arbitrary"),   # batch shards || , time serial
        vmem_limit_bytes=vmem_limit)
    scratch_shapes = [
        pltpu.VMEM((Bs, Hp), jnp.float32),   # h state (persists across time chunks)
        pltpu.VMEM((Bs, Hp), jnp.float32),   # c state
    ]

    def _call(whh_spec):
        return pl.pallas_call(
            kernel,
            out_shape=out_shape,
            grid_spec=pltpu.PrefetchScalarGridSpec(
                num_scalar_prefetch=0,
                grid=(batch_shards, n_chunks),
                in_specs=[xp_spec, whh_spec],
                out_specs=out_spec,
                scratch_shapes=scratch_shapes,
            ),
            compiler_params=compiler_params,
        )(x_proj, whh_p)

    try:
        # W_hh index_map is constant -> single pipeline buffer (halves its VMEM).
        h_all = _call(pl.BlockSpec((Hp, 4 * Hp), lambda b, c: (0, 0),
                                   pipeline_mode=pl.Buffered(1)))
    except Exception:  # pragma: no cover - Pallas build without single-buffer support
        h_all = _call(pl.BlockSpec((Hp, 4 * Hp), lambda b, c: (0, 0)))

    # ---- fc head on the whole hidden sequence: one big GEMM, outside loop ----
    out_tm = jnp.einsum(
        "tbh,ho->tbo",
        h_all[:T].astype(matmul_dtype), wfc_p.astype(matmul_dtype),
        preferred_element_type=jnp.float32) + b_fc.astype(jnp.float32)
    return jnp.transpose(out_tm, (1, 0, 2))                           # (B, T, O)


# ----------------------------------------------------------------------------
# Pure-JAX reference matching torch.nn.LSTM(batch_first=True) + Linear.
# ----------------------------------------------------------------------------
def _reference_forward(x, params):
    w_ih, w_hh, b_ih, b_hh, w_fc, b_fc = (
        params["w_ih"], params["w_hh"], params["b_ih"], params["b_hh"],
        params["w_fc"], params["b_fc"])
    B, T, _ = x.shape
    H = w_hh.shape[1]

    def step(carry, x_t):
        h, c = carry
        gates = x_t @ w_ih.T + h @ w_hh.T + b_ih + b_hh
        i, f, g, o = jnp.split(gates, 4, axis=-1)
        i, f, o = jax.nn.sigmoid(i), jax.nn.sigmoid(f), jax.nn.sigmoid(o)
        g = jnp.tanh(g)
        c = f * c + i * g
        h = o * jnp.tanh(c)
        return (h, c), h

    h0 = jnp.zeros((B, H), jnp.float32)
    c0 = jnp.zeros((B, H), jnp.float32)
    _, hs = jax.lax.scan(step, (h0, c0), jnp.transpose(x, (1, 0, 2)))
    hs = jnp.transpose(hs, (1, 0, 2))                                  # (B, T, H)
    return hs @ w_fc.T + b_fc


def init_params(key, input_size, hidden_size, output_size):
    """PyTorch-shaped params, U(-1/sqrt(H), 1/sqrt(H)) init."""
    ks = jax.random.split(key, 6)
    bound = 1.0 / jnp.sqrt(hidden_size)
    u = lambda k, shp: jax.random.uniform(k, shp, jnp.float32, -bound, bound)
    return {
        "w_ih": u(ks[0], (4 * hidden_size, input_size)),
        "w_hh": u(ks[1], (4 * hidden_size, hidden_size)),
        "b_ih": u(ks[2], (4 * hidden_size,)),
        "b_hh": u(ks[3], (4 * hidden_size,)),
        "w_fc": u(ks[4], (output_size, hidden_size)),
        "b_fc": u(ks[5], (output_size,)),
    }


if __name__ == "__main__":
    B, T = 2, 8
    input_size, hidden_size, output_size = 16, 32, 8

    key = jax.random.PRNGKey(0)
    k_x, k_p = jax.random.split(key)
    x = jax.random.normal(k_x, (B, T, input_size), jnp.float32)
    params = init_params(k_p, input_size, hidden_size, output_size)

    ref = jax.block_until_ready(_reference_forward(x, params))

    # Exact-math config: f32 MXU operands; t_chunk=3 does not divide T=8, so this also
    # exercises time padding and h/c state carry across multiple grid chunks.
    out_f32 = jax.block_until_ready(
        vanilla_lstm_forward(x, params, t_chunk=3, matmul_dtype=jnp.float32))
    assert out_f32.shape == (B, T, output_size)
    assert jnp.allclose(out_f32, ref, atol=1e-4, rtol=1e-4), "f32 mismatch vs reference"

    # Default perf config: bf16 MXU operands + bf16 x_proj/h_all streaming,
    # t_chunk=T (time grid dim == 1), f32 accumulation / gate math / state.
    out_bf16 = jax.block_until_ready(vanilla_lstm_forward(x, params))
    assert out_bf16.shape == (B, T, output_size)
    assert jnp.allclose(out_bf16, ref, atol=1e-1, rtol=1e-1), "bf16 mismatch vs reference"

    print("KERNEL_OK")
</pallas_src>

<mosaic_0001>
module attributes {stable_mosaic.version = 11 : i64} {
  func.func @_lstm_recurrence_kernel(%arg0: i32, %arg1: i32, %arg2: memref<3x2x512xf32, #tpu.memory_space<vmem>>, %arg3: memref<128x512xf32, #tpu.memory_space<vmem>>, %arg4: memref<3x2x128xf32, #tpu.memory_space<vmem>>, %arg5: memref<2x128xf32, #tpu.memory_space<vmem>>, %arg6: memref<2x128xf32, #tpu.memory_space<vmem>>) attributes {dimension_semantics = [#tpu.dimension_semantics<parallel>, #tpu.dimension_semantics<arbitrary>], iteration_bounds = array<i64: 1, 3>, scalar_prefetch = 0 : i64, scratch_operands = 2 : i64, tpu.core_type = #tpu.core_type<tc>, window_params = [{transform_indices = @transform_0, window_bounds = array<i64: 3, 2, 512>}, {pipeline_mode = #tpu.pipeline_mode<synchronous>, transform_indices = @transform_1, window_bounds = array<i64: 128, 512>}, {transform_indices = @transform_2, window_bounds = array<i64: 3, 2, 128>}]} {
    %c0_i32 = arith.constant 0 : i32
    %0 = arith.cmpi eq, %arg1, %c0_i32 : i32
    %1 = arith.extui %0 : i1 to i32
    %c0_i32_0 = arith.constant 0 : i32
    %2 = arith.cmpi ne, %1, %c0_i32_0 : i32
    scf.if %2 {
      %cst_54 = arith.constant 0.000000e+00 : f32
      %120 = vector.broadcast %cst_54 : f32 to vector<2x128xf32>
      %c0_55 = arith.constant 0 : index
      %c0_56 = arith.constant 0 : index
      %121 = vector.load %arg5[%c0_55, %c0_56] : memref<2x128xf32, #tpu.memory_space<vmem>>, vector<2x128xf32>
      tpu.vector_store %arg5[%c0_55, %c0_56], %120 {strides = array<i32>} : memref<2x128xf32, #tpu.memory_space<vmem>>, vector<2x128xf32>,
      %cst_57 = arith.constant 0.000000e+00 : f32
      %122 = vector.broadcast %cst_57 : f32 to vector<2x128xf32>
      %c0_58 = arith.constant 0 : index
      %c0_59 = arith.constant 0 : index
      %123 = vector.load %arg6[%c0_58, %c0_59] : memref<2x128xf32, #tpu.memory_space<vmem>>, vector<2x128xf32>
      tpu.vector_store %arg6[%c0_58, %c0_59], %122 {strides = array<i32>} : memref<2x128xf32, #tpu.memory_space<vmem>>, vector<2x128xf32>,
    } else {
    }
    %c0_i32_1 = arith.constant 0 : i32
    %c0 = arith.constant 0 : index
    %c0_2 = arith.constant 0 : index
    %3 = vector.load %arg5[%c0, %c0_2] : memref<2x128xf32, #tpu.memory_space<vmem>>, vector<2x128xf32>
    %c0_3 = arith.constant 0 : index
    %c0_4 = arith.constant 0 : index
    %4 = vector.load %arg6[%c0_3, %c0_4] : memref<2x128xf32, #tpu.memory_space<vmem>>, vector<2x128xf32>
    %c0_5 = arith.constant 0 : index
    %c0_6 = arith.constant 0 : index
    %5 = vector.load %arg3[%c0_5, %c0_6] : memref<128x512xf32, #tpu.memory_space<vmem>>, vector<128x512xf32>
    %cst = arith.constant dense<0.000000e+00> : vector<2x512xf32>
    %6 = tpu.matmul %3, %5, %cst {dimension_numbers = #tpu.dot_dimension_numbers<[1], [0], [0], [1], [0, 0, 1, 1], [], []>} : vector<2x128xf32>, vector<128x512xf32>, vector<2x512xf32> -> vector<2x512xf32>
    %7 = arith.index_cast %c0_i32_1 : i32 to index
    %c0_7 = arith.constant 0 : index
    %c0_8 = arith.constant 0 : index
    %8 = vector.load %arg2[%7, %c0_7, %c0_8] : memref<3x2x512xf32, #tpu.memory_space<vmem>>, vector<1x2x512xf32>
    %9 = vector.shape_cast %8 : vector<1x2x512xf32> to vector<2x512xf32>
    %10 = arith.addf %6, %9 : vector<2x512xf32>
    %11 = vector.extract_strided_slice %10 {offsets = [0, 0], sizes = [2, 128], strides = [1, 1]} : vector<2x512xf32> to vector<2x128xf32>
    %12 = arith.negf %11 : vector<2x128xf32>
    %13 = math.exp %12 : vector<2x128xf32>
    %cst_9 = arith.constant 1.000000e+00 : f32
    %14 = vector.broadcast %cst_9 : f32 to vector<2x128xf32>
    %15 = arith.addf %14, %13 : vector<2x128xf32>
    %16 = arith.divf %14, %15 : vector<2x128xf32>
    %17 = vector.extract_strided_slice %10 {offsets = [0, 128], sizes = [2, 128], strides = [1, 1]} : vector<2x512xf32> to vector<2x128xf32>
    %18 = arith.negf %17 : vector<2x128xf32>
    %19 = math.exp %18 : vector<2x128xf32>
    %cst_10 = arith.constant 1.000000e+00 : f32
    %20 = vector.broadcast %cst_10 : f32 to vector<2x128xf32>
    %21 = arith.addf %20, %19 : vector<2x128xf32>
    %22 = arith.divf %20, %21 : vector<2x128xf32>
    %23 = vector.extract_strided_slice %10 {offsets = [0, 256], sizes = [2, 128], strides = [1, 1]} : vector<2x512xf32> to vector<2x128xf32>
    %24 = math.tanh %23 : vector<2x128xf32>
    %25 = vector.extract_strided_slice %10 {offsets = [0, 384], sizes = [2, 128], strides = [1, 1]} : vector<2x512xf32> to vector<2x128xf32>
    %26 = arith.negf %25 : vector<2x128xf32>
    %27 = math.exp %26 : vector<2x128xf32>
    %cst_11 = arith.constant 1.000000e+00 : f32
    %28 = vector.broadcast %cst_11 : f32 to vector<2x128xf32>
    %29 = arith.addf %28, %27 : vector<2x128xf32>
    %30 = arith.divf %28, %29 : vector<2x128xf32>
    %31 = arith.mulf %22, %4 : vector<2x128xf32>
    %32 = arith.mulf %16, %24 : vector<2x128xf32>
    %33 = arith.addf %31, %32 : vector<2x128xf32>
    %34 = math.tanh %33 : vector<2x128xf32>
    %35 = arith.mulf %30, %34 : vector<2x128xf32>
    %c0_12 = arith.constant 0 : index
    %c0_13 = arith.constant 0 : index
    %36 = vector.load %arg6[%c0_12, %c0_13] : memref<2x128xf32, #tpu.memory_space<vmem>>, vector<2x128xf32>
    tpu.vector_store %arg6[%c0_12, %c0_13], %33 {strides = array<i32>} : memref<2x128xf32, #tpu.memory_space<vmem>>, vector<2x128xf32>,
    %c0_14 = arith.constant 0 : index
    %c0_15 = arith.constant 0 : index
    %37 = vector.load %arg5[%c0_14, %c0_15] : memref<2x128xf32, #tpu.memory_space<vmem>>, vector<2x128xf32>
    tpu.vector_store %arg5[%c0_14, %c0_15], %35 {strides = array<i32>} : memref<2x128xf32, #tpu.memory_space<vmem>>, vector<2x128xf32>,
    %38 = arith.index_cast %c0_i32_1 : i32 to index
    %c0_16 = arith.constant 0 : index
    %c0_17 = arith.constant 0 : index
    %39 = vector.load %arg4[%38, %c0_16, %c0_17] : memref<3x2x128xf32, #tpu.memory_space<vmem>>, vector<1x2x128xf32>
    %40 = vector.shape_cast %39 : vector<1x2x128xf32> to vector<2x128xf32>
    %41 = vector.shape_cast %35 : vector<2x128xf32> to vector<1x2x128xf32>
    tpu.vector_store %arg4[%38, %c0_16, %c0_17], %41 {strides = array<i32>} : memref<3x2x128xf32, #tpu.memory_space<vmem>>, vector<1x2x128xf32>,
    %c1_i32 = arith.constant 1 : i32
    %c0_18 = arith.constant 0 : index
    %c0_19 = arith.constant 0 : index
    %42 = vector.load %arg5[%c0_18, %c0_19] : memref<2x128xf32, #tpu.memory_space<vmem>>, vector<2x128xf32>
    %c0_20 = arith.constant 0 : index
    %c0_21 = arith.constant 0 : index
    %43 = vector.load %arg6[%c0_20, %c0_21] : memref<2x128xf32, #tpu.memory_space<vmem>>, vector<2x128xf32>
    %c0_22 = arith.constant 0 : index
    %c0_23 = arith.constant 0 : index
    %44 = vector.load %arg3[%c0_22, %c0_23] : memref<128x512xf32, #tpu.memory_space<vmem>>, vector<128x512xf32>
    %cst_24 = arith.constant dense<0.000000e+00> : vector<2x512xf32>
    %45 = tpu.matmul %42, %44, %cst_24 {dimension_numbers = #tpu.dot_dimension_numbers<[1], [0], [0], [1], [0, 0, 1, 1], [], []>} : vector<2x128xf32>, vector<128x512xf32>, vector<2x512xf32> -> vector<2x512xf32>
    %46 = arith.index_cast %c1_i32 : i32 to index
    %c0_25 = arith.constant 0 : index
    %c0_26 = arith.constant 0 : index
    %47 = vector.load %arg2[%46, %c0_25, %c0_26] : memref<3x2x512xf32, #tpu.memory_space<vmem>>, vector<1x2x512xf32>
    %48 = vector.shape_cast %47 : vector<1x2x512xf32> to vector<2x512xf32>
    %49 = arith.addf %45, %48 : vector<2x512xf32>
    %50 = vector.extract_strided_slice %49 {offsets = [0, 0], sizes = [2, 128], strides = [1, 1]} : vector<2x512xf32> to vector<2x128xf32>
    %51 = arith.negf %50 : vector<2x128xf32>
    %52 = math.exp %51 : vector<2x128xf32>
    %cst_27 = arith.constant 1.000000e+00 : f32
    %53 = vector.broadcast %cst_27 : f32 to vector<2x128xf32>
    %54 = arith.addf %53, %52 : vector<2x128xf32>
    %55 = arith.divf %53, %54 : vector<2x128xf32>
    %56 = vector.extract_strided_slice %49 {offsets = [0, 128], sizes = [2, 128], strides = [1, 1]} : vector<2x512xf32> to vector<2x128xf32>
    %57 = arith.negf %56 : vector<2x128xf32>
    %58 = math.exp %57 : vector<2x128xf32>
    %cst_28 = arith.constant 1.000000e+00 : f32
    %59 = vector.broadcast %cst_28 : f32 to vector<2x128xf32>
    %60 = arith.addf %59, %58 : vector<2x128xf32>
    %61 = arith.divf %59, %60 : vector<2x128xf32>
    %62 = vector.extract_strided_slice %49 {offsets = [0, 256], sizes = [2, 128], strides = [1, 1]} : vector<2x512xf32> to vector<2x128xf32>
    %63 = math.tanh %62 : vector<2x128xf32>
    %64 = vector.extract_strided_slice %49 {offsets = [0, 384], sizes = [2, 128], strides = [1, 1]} : vector<2x512xf32> to vector<2x128xf32>
    %65 = arith.negf %64 : vector<2x128xf32>
    %66 = math.exp %65 : vector<2x128xf32>
    %cst_29 = arith.constant 1.000000e+00 : f32
    %67 = vector.broadcast %cst_29 : f32 to vector<2x128xf32>
    %68 = arith.addf %67, %66 : vector<2x128xf32>
    %69 = arith.divf %67, %68 : vector<2x128xf32>
    %70 = arith.mulf %61, %43 : vector<2x128xf32>
    %71 = arith.mulf %55, %63 : vector<2x128xf32>
    %72 = arith.addf %70, %71 : vector<2x128xf32>
    %73 = math.tanh %72 : vector<2x128xf32>
    %74 = arith.mulf %69, %73 : vector<2x128xf32>
    %c0_30 = arith.constant 0 : index
    %c0_31 = arith.constant 0 : index
    %75 = vector.load %arg6[%c0_30, %c0_31] : memref<2x128xf32, #tpu.memory_space<vmem>>, vector<2x128xf32>
    tpu.vector_store %arg6[%c0_30, %c0_31], %72 {strides = array<i32>} : memref<2x128xf32, #tpu.memory_space<vmem>>, vector<2x128xf32>,
    %c0_32 = arith.constant 0 : index
    %c0_33 = arith.constant 0 : index
    %76 = vector.load %arg5[%c0_32, %c0_33] : memref<2x128xf32, #tpu.memory_space<vmem>>, vector<2x128xf32>
    tpu.vector_store %arg5[%c0_32, %c0_33], %74 {strides = array<i32>} : memref<2x128xf32, #tpu.memory_space<vmem>>, vector<2x128xf32>,
    %77 = arith.index_cast %c1_i32 : i32 to index
    %c0_34 = arith.constant 0 : index
    %c0_35 = arith.constant 0 : index
    %78 = vector.load %arg4[%77, %c0_34, %c0_35] : memref<3x2x128xf32, #tpu.memory_space<vmem>>, vector<1x2x128xf32>
    %79 = vector.shape_cast %78 : vector<1x2x128xf32> to vector<2x128xf32>
    %80 = vector.shape_cast %74 : vector<2x128xf32> to vector<1x2x128xf32>
    tpu.vector_store %arg4[%77, %c0_34, %c0_35], %80 {strides = array<i32>} : memref<3x2x128xf32, #tpu.memory_space<vmem>>, vector<1x2x128xf32>,
    %c2_i32 = arith.constant 2 : i32
    %c0_36 = arith.constant 0 : index
    %c0_37 = arith.constant 0 : index
    %81 = vector.load %arg5[%c0_36, %c0_37] : memref<2x128xf32, #tpu.memory_space<vmem>>, vector<2x128xf32>
    %c0_38 = arith.constant 0 : index
    %c0_39 = arith.constant 0 : index
    %82 = vector.load %arg6[%c0_38, %c0_39] : memref<2x128xf32, #tpu.memory_space<vmem>>, vector<2x128xf32>
    %c0_40 = arith.constant 0 : index
    %c0_41 = arith.constant 0 : index
    %83 = vector.load %arg3[%c0_40, %c0_41] : memref<128x512xf32, #tpu.memory_space<vmem>>, vector<128x512xf32>
    %cst_42 = arith.constant dense<0.000000e+00> : vector<2x512xf32>
    %84 = tpu.matmul %81, %83, %cst_42 {dimension_numbers = #tpu.dot_dimension_numbers<[1], [0], [0], [1], [0, 0, 1, 1], [], []>} : vector<2x128xf32>, vector<128x512xf32>, vector<2x512xf32> -> vector<2x512xf32>
    %85 = arith.index_cast %c2_i32 : i32 to index
    %c0_43 = arith.constant 0 : index
    %c0_44 = arith.constant 0 : index
    %86 = vector.load %arg2[%85, %c0_43, %c0_44] : memref<3x2x512xf32, #tpu.memory_space<vmem>>, vector<1x2x512xf32>
    %87 = vector.shape_cast %86 : vector<1x2x512xf32> to vector<2x512xf32>
    %88 = arith.addf %84, %87 : vector<2x512xf32>
    %89 = vector.extract_strided_slice %88 {offsets = [0, 0], sizes = [2, 128], strides = [1, 1]} : vector<2x512xf32> to vector<2x128xf32>
    %90 = arith.negf %89 : vector<2x128xf32>
    %91 = math.exp %90 : vector<2x128xf32>
    %cst_45 = arith.constant 1.000000e+00 : f32
    %92 = vector.broadcast %cst_45 : f32 to vector<2x128xf32>
    %93 = arith.addf %92, %91 : vector<2x128xf32>
    %94 = arith.divf %92, %93 : vector<2x128xf32>
    %95 = vector.extract_strided_slice %88 {offsets = [0, 128], sizes = [2, 128], strides = [1, 1]} : vector<2x512xf32> to vector<2x128xf32>
    %96 = arith.negf %95 : vector<2x128xf32>
    %97 = math.exp %96 : vector<2x128xf32>
    %cst_46 = arith.constant 1.000000e+00 : f32
    %98 = vector.broadcast %cst_46 : f32 to vector<2x128xf32>
    %99 = arith.addf %98, %97 : vector<2x128xf32>
    %100 = arith.divf %98, %99 : vector<2x128xf32>
    %101 = vector.extract_strided_slice %88 {offsets = [0, 256], sizes = [2, 128], strides = [1, 1]} : vector<2x512xf32> to vector<2x128xf32>
    %102 = math.tanh %101 : vector<2x128xf32>
    %103 = vector.extract_strided_slice %88 {offsets = [0, 384], sizes = [2, 128], strides = [1, 1]} : vector<2x512xf32> to vector<2x128xf32>
    %104 = arith.negf %103 : vector<2x128xf32>
    %105 = math.exp %104 : vector<2x128xf32>
    %cst_47 = arith.constant 1.000000e+00 : f32
    %106 = vector.broadcast %cst_47 : f32 to vector<2x128xf32>
    %107 = arith.addf %106, %105 : vector<2x128xf32>
    %108 = arith.divf %106, %107 : vector<2x128xf32>
    %109 = arith.mulf %100, %82 : vector<2x128xf32>
    %110 = arith.mulf %94, %102 : vector<2x128xf32>
    %111 = arith.addf %109, %110 : vector<2x128xf32>
    %112 = math.tanh %111 : vector<2x128xf32>
    %113 = arith.mulf %108, %112 : vector<2x128xf32>
    %c0_48 = arith.constant 0 : index
    %c0_49 = arith.constant 0 : index
    %114 = vector.load %arg6[%c0_48, %c0_49] : memref<2x128xf32, #tpu.memory_space<vmem>>, vector<2x128xf32>
    tpu.vector_store %arg6[%c0_48, %c0_49], %111 {strides = array<i32>} : memref<2x128xf32, #tpu.memory_space<vmem>>, vector<2x128xf32>,
    %c0_50 = arith.constant 0 : index
    %c0_51 = arith.constant 0 : index
    %115 = vector.load %arg5[%c0_50, %c0_51] : memref<2x128xf32, #tpu.memory_space<vmem>>, vector<2x128xf32>
    tpu.vector_store %arg5[%c0_50, %c0_51], %113 {strides = array<i32>} : memref<2x128xf32, #tpu.memory_space<vmem>>, vector<2x128xf32>,
    %116 = arith.index_cast %c2_i32 : i32 to index
    %c0_52 = arith.constant 0 : index
    %c0_53 = arith.constant 0 : index
    %117 = vector.load %arg4[%116, %c0_52, %c0_53] : memref<3x2x128xf32, #tpu.memory_space<vmem>>, vector<1x2x128xf32>
    %118 = vector.shape_cast %117 : vector<1x2x128xf32> to vector<2x128xf32>
    %119 = vector.shape_cast %113 : vector<2x128xf32> to vector<1x2x128xf32>
    tpu.vector_store %arg4[%116, %c0_52, %c0_53], %119 {strides = array<i32>} : memref<3x2x128xf32, #tpu.memory_space<vmem>>, vector<1x2x128xf32>,
    %c3_i32 = arith.constant 3 : i32
    return
  }
  func.func @transform_0(%arg0: i32, %arg1: i32) -> (i32, i32, i32) {
    %c0_i32 = arith.constant 0 : i32
    %c0_i32_0 = arith.constant 0 : i32
    return %arg1, %arg0, %c0_i32 : i32, i32, i32
  }
  func.func @transform_1(%arg0: i32, %arg1: i32) -> (i32, i32) {
    %c0_i32 = arith.constant 0 : i32
    %c0_i32_0 = arith.constant 0 : i32
    %c0_i32_1 = arith.constant 0 : i32
    return %c0_i32, %c0_i32_0 : i32, i32
  }
  func.func @transform_2(%arg0: i32, %arg1: i32) -> (i32, i32, i32) {
    %c0_i32 = arith.constant 0 : i32
    %c0_i32_0 = arith.constant 0 : i32
    return %arg1, %arg0, %c0_i32 : i32, i32, i32
  }
}

module attributes {stable_mosaic.version = 11 : i64} {
  func.func @_lstm_recurrence_kernel(%arg0: i32, %arg1: i32, %arg2: memref<3x2x512xf32, #tpu.memory_space<vmem>>, %arg3: memref<128x512xf32, #tpu.memory_space<vmem>>, %arg4: memref<3x2x128xf32, #tpu.memory_space<vmem>>, %arg5: memref<2x128xf32, #tpu.memory_space<vmem>>, %arg6: memref<2x128xf32, #tpu.memory_space<vmem>>) attributes {dimension_semantics = [#tpu.dimension_semantics<parallel>, #tpu.dimension_semantics<arbitrary>], iteration_bounds = array<i64: 1, 3>, scalar_prefetch = 0 : i64, scratch_operands = 2 : i64, tpu.core_type = #tpu.core_type<tc>, window_params = [{transform_indices = @transform_0, window_bounds = array<i64: 3, 2, 512>}, {pipeline_mode = #tpu.pipeline_mode<synchronous>, transform_indices = @transform_1, window_bounds = array<i64: 128, 512>}, {transform_indices = @transform_2, window_bounds = array<i64: 3, 2, 128>}]} {
    %c0_i32 = arith.constant 0 : i32
    %0 = arith.cmpi eq, %arg1, %c0_i32 : i32
    %1 = arith.extui %0 : i1 to i32
    %c0_i32_0 = arith.constant 0 : i32
    %2 = arith.cmpi ne, %1, %c0_i32_0 : i32
    scf.if %2 {
      %cst_54 = arith.constant 0.000000e+00 : f32
      %120 = vector.broadcast %cst_54 : f32 to vector<2x128xf32>
      %c0_55 = arith.constant 0 : index
      %c0_56 = arith.constant 0 : index
      %121 = vector.load %arg5[%c0_55, %c0_56] : memref<2x128xf32, #tpu.memory_space<vmem>>, vector<2x128xf32>
      tpu.vector_store %arg5[%c0_55, %c0_56], %120 {strides = array<i32>} : memref<2x128xf32, #tpu.memory_space<vmem>>, vector<2x128xf32>,
      %cst_57 = arith.constant 0.000000e+00 : f32
      %122 = vector.broadcast %cst_57 : f32 to vector<2x128xf32>
      %c0_58 = arith.constant 0 : index
      %c0_59 = arith.constant 0 : index
      %123 = vector.load %arg6[%c0_58, %c0_59] : memref<2x128xf32, #tpu.memory_space<vmem>>, vector<2x128xf32>
      tpu.vector_store %arg6[%c0_58, %c0_59], %122 {strides = array<i32>} : memref<2x128xf32, #tpu.memory_space<vmem>>, vector<2x128xf32>,
    } else {
    }
    %c0_i32_1 = arith.constant 0 : i32
    %c0 = arith.constant 0 : index
    %c0_2 = arith.constant 0 : index
    %3 = vector.load %arg5[%c0, %c0_2] : memref<2x128xf32, #tpu.memory_space<vmem>>, vector<2x128xf32>
    %c0_3 = arith.constant 0 : index
    %c0_4 = arith.constant 0 : index
    %4 = vector.load %arg6[%c0_3, %c0_4] : memref<2x128xf32, #tpu.memory_space<vmem>>, vector<2x128xf32>
    %c0_5 = arith.constant 0 : index
    %c0_6 = arith.constant 0 : index
    %5 = vector.load %arg3[%c0_5, %c0_6] : memref<128x512xf32, #tpu.memory_space<vmem>>, vector<128x512xf32>
    %cst = arith.constant dense<0.000000e+00> : vector<2x512xf32>
    %6 = tpu.matmul %3, %5, %cst {dimension_numbers = #tpu.dot_dimension_numbers<[1], [0], [0], [1], [0, 0, 1, 1], [], []>} : vector<2x128xf32>, vector<128x512xf32>, vector<2x512xf32> -> vector<2x512xf32>
    %7 = arith.index_cast %c0_i32_1 : i32 to index
    %c0_7 = arith.constant 0 : index
    %c0_8 = arith.constant 0 : index
    %8 = vector.load %arg2[%7, %c0_7, %c0_8] : memref<3x2x512xf32, #tpu.memory_space<vmem>>, vector<1x2x512xf32>
    %9 = vector.shape_cast %8 : vector<1x2x512xf32> to vector<2x512xf32>
    %10 = arith.addf %6, %9 : vector<2x512xf32>
    %11 = vector.extract_strided_slice %10 {offsets = [0, 0], sizes = [2, 128], strides = [1, 1]} : vector<2x512xf32> to vector<2x128xf32>
    %12 = arith.negf %11 : vector<2x128xf32>
    %13 = math.exp %12 : vector<2x128xf32>
    %cst_9 = arith.constant 1.000000e+00 : f32
    %14 = vector.broadcast %cst_9 : f32 to vector<2x128xf32>
    %15 = arith.addf %14, %13 : vector<2x128xf32>
    %16 = arith.divf %14, %15 : vector<2x128xf32>
    %17 = vector.extract_strided_slice %10 {offsets = [0, 128], sizes = [2, 128], strides = [1, 1]} : vector<2x512xf32> to vector<2x128xf32>
    %18 = arith.negf %17 : vector<2x128xf32>
    %19 = math.exp %18 : vector<2x128xf32>
    %cst_10 = arith.constant 1.000000e+00 : f32
    %20 = vector.broadcast %cst_10 : f32 to vector<2x128xf32>
    %21 = arith.addf %20, %19 : vector<2x128xf32>
    %22 = arith.divf %20, %21 : vector<2x128xf32>
    %23 = vector.extract_strided_slice %10 {offsets = [0, 256], sizes = [2, 128], strides = [1, 1]} : vector<2x512xf32> to vector<2x128xf32>
    %24 = math.tanh %23 : vector<2x128xf32>
    %25 = vector.extract_strided_slice %10 {offsets = [0, 384], sizes = [2, 128], strides = [1, 1]} : vector<2x512xf32> to vector<2x128xf32>
    %26 = arith.negf %25 : vector<2x128xf32>
    %27 = math.exp %26 : vector<2x128xf32>
    %cst_11 = arith.constant 1.000000e+00 : f32
    %28 = vector.broadcast %cst_11 : f32 to vector<2x128xf32>
    %29 = arith.addf %28, %27 : vector<2x128xf32>
    %30 = arith.divf %28, %29 : vector<2x128xf32>
    %31 = arith.mulf %22, %4 : vector<2x128xf32>
    %32 = arith.mulf %16, %24 : vector<2x128xf32>
    %33 = arith.addf %31, %32 : vector<2x128xf32>
    %34 = math.tanh %33 : vector<2x128xf32>
    %35 = arith.mulf %30, %34 : vector<2x128xf32>
    %c0_12 = arith.constant 0 : index
    %c0_13 = arith.constant 0 : index
    %36 = vector.load %arg6[%c0_12, %c0_13] : memref<2x128xf32, #tpu.memory_space<vmem>>, vector<2x128xf32>
    tpu.vector_store %arg6[%c0_12, %c0_13], %33 {strides = array<i32>} : memref<2x128xf32, #tpu.memory_space<vmem>>, vector<2x128xf32>,
    %c0_14 = arith.constant 0 : index
    %c0_15 = arith.constant 0 : index
    %37 = vector.load %arg5[%c0_14, %c0_15] : memref<2x128xf32, #tpu.memory_space<vmem>>, vector<2x128xf32>
    tpu.vector_store %arg5[%c0_14, %c0_15], %35 {strides = array<i32>} : memref<2x128xf32, #tpu.memory_space<vmem>>, vector<2x128xf32>,
    %38 = arith.index_cast %c0_i32_1 : i32 to index
    %c0_16 = arith.constant 0 : index
    %c0_17 = arith.constant 0 : index
    %39 = vector.load %arg4[%38, %c0_16, %c0_17] : memref<3x2x128xf32, #tpu.memory_space<vmem>>, vector<1x2x128xf32>
    %40 = vector.shape_cast %39 : vector<1x2x128xf32> to vector<2x128xf32>
    %41 = vector.shape_cast %35 : vector<2x128xf32> to vector<1x2x128xf32>
    tpu.vector_store %arg4[%38, %c0_16, %c0_17], %41 {strides = array<i32>} : memref<3x2x128xf32, #tpu.memory_space<vmem>>, vector<1x2x128xf32>,
    %c1_i32 = arith.constant 1 : i32
    %c0_18 = arith.constant 0 : index
    %c0_19 = arith.constant 0 : index
    %42 = vector.load %arg5[%c0_18, %c0_19] : memref<2x128xf32, #tpu.memory_space<vmem>>, vector<2x128xf32>
    %c0_20 = arith.constant 0 : index
    %c0_21 = arith.constant 0 : index
    %43 = vector.load %arg6[%c0_20, %c0_21] : memref<2x128xf32, #tpu.memory_space<vmem>>, vector<2x128xf32>
    %c0_22 = arith.constant 0 : index
    %c0_23 = arith.constant 0 : index
    %44 = vector.load %arg3[%c0_22, %c0_23] : memref<128x512xf32, #tpu.memory_space<vmem>>, vector<128x512xf32>
    %cst_24 = arith.constant dense<0.000000e+00> : vector<2x512xf32>
    %45 = tpu.matmul %42, %44, %cst_24 {dimension_numbers = #tpu.dot_dimension_numbers<[1], [0], [0], [1], [0, 0, 1, 1], [], []>} : vector<2x128xf32>, vector<128x512xf32>, vector<2x512xf32> -> vector<2x512xf32>
    %46 = arith.index_cast %c1_i32 : i32 to index
    %c0_25 = arith.constant 0 : index
    %c0_26 = arith.constant 0 : index
    %47 = vector.load %arg2[%46, %c0_25, %c0_26] : memref<3x2x512xf32, #tpu.memory_space<vmem>>, vector<1x2x512xf32>
    %48 = vector.shape_cast %47 : vector<1x2x512xf32> to vector<2x512xf32>
    %49 = arith.addf %45, %48 : vector<2x512xf32>
    %50 = vector.extract_strided_slice %49 {offsets = [0, 0], sizes = [2, 128], strides = [1, 1]} : vector<2x512xf32> to vector<2x128xf32>
    %51 = arith.negf %50 : vector<2x128xf32>
    %52 = math.exp %51 : vector<2x128xf32>
    %cst_27 = arith.constant 1.000000e+00 : f32
    %53 = vector.broadcast %cst_27 : f32 to vector<2x128xf32>
    %54 = arith.addf %53, %52 : vector<2x128xf32>
    %55 = arith.divf %53, %54 : vector<2x128xf32>
    %56 = vector.extract_strided_slice %49 {offsets = [0, 128], sizes = [2, 128], strides = [1, 1]} : vector<2x512xf32> to vector<2x128xf32>
    %57 = arith.negf %56 : vector<2x128xf32>
    %58 = math.exp %57 : vector<2x128xf32>
    %cst_28 = arith.constant 1.000000e+00 : f32
    %59 = vector.broadcast %cst_28 : f32 to vector<2x128xf32>
    %60 = arith.addf %59, %58 : vector<2x128xf32>
    %61 = arith.divf %59, %60 : vector<2x128xf32>
    %62 = vector.extract_strided_slice %49 {offsets = [0, 256], sizes = [2, 128], strides = [1, 1]} : vector<2x512xf32> to vector<2x128xf32>
    %63 = math.tanh %62 : vector<2x128xf32>
    %64 = vector.extract_strided_slice %49 {offsets = [0, 384], sizes = [2, 128], strides = [1, 1]} : vector<2x512xf32> to vector<2x128xf32>
    %65 = arith.negf %64 : vector<2x128xf32>
    %66 = math.exp %65 : vector<2x128xf32>
    %cst_29 = arith.constant 1.000000e+00 : f32
    %67 = vector.broadcast %cst_29 : f32 to vector<2x128xf32>
    %68 = arith.addf %67, %66 : vector<2x128xf32>
    %69 = arith.divf %67, %68 : vector<2x128xf32>
    %70 = arith.mulf %61, %43 : vector<2x128xf32>
    %71 = arith.mulf %55, %63 : vector<2x128xf32>
    %72 = arith.addf %70, %71 : vector<2x128xf32>
    %73 = math.tanh %72 : vector<2x128xf32>
    %74 = arith.mulf %69, %73 : vector<2x128xf32>
    %c0_30 = arith.constant 0 : index
    %c0_31 = arith.constant 0 : index
    %75 = vector.load %arg6[%c0_30, %c0_31] : memref<2x128xf32, #tpu.memory_space<vmem>>, vector<2x128xf32>
    tpu.vector_store %arg6[%c0_30, %c0_31], %72 {strides = array<i32>} : memref<2x128xf32, #tpu.memory_space<vmem>>, vector<2x128xf32>,
    %c0_32 = arith.constant 0 : index
    %c0_33 = arith.constant 0 : index
    %76 = vector.load %arg5[%c0_32, %c0_33] : memref<2x128xf32, #tpu.memory_space<vmem>>, vector<2x128xf32>
    tpu.vector_store %arg5[%c0_32, %c0_33], %74 {strides = array<i32>} : memref<2x128xf32, #tpu.memory_space<vmem>>, vector<2x128xf32>,
    %77 = arith.index_cast %c1_i32 : i32 to index
    %c0_34 = arith.constant 0 : index
    %c0_35 = arith.constant 0 : index
    %78 = vector.load %arg4[%77, %c0_34, %c0_35] : memref<3x2x128xf32, #tpu.memory_space<vmem>>, vector<1x2x128xf32>
    %79 = vector.shape_cast %78 : vector<1x2x128xf32> to vector<2x128xf32>
    %80 = vector.shape_cast %74 : vector<2x128xf32> to vector<1x2x128xf32>
    tpu.vector_store %arg4[%77, %c0_34, %c0_35], %80 {strides = array<i32>} : memref<3x2x128xf32, #tpu.memory_space<vmem>>, vector<1x2x128xf32>,
    %c2_i32 = arith.constant 2 : i32
    %c0_36 = arith.constant 0 : index
    %c0_37 = arith.constant 0 : index
    %81 = vector.load %arg5[%c0_36, %c0_37] : memref<2x128xf32, #tpu.memory_space<vmem>>, vector<2x128xf32>
    %c0_38 = arith.constant 0 : index
    %c0_39 = arith.constant 0 : index
    %82 = vector.load %arg6[%c0_38, %c0_39] : memref<2x128xf32, #tpu.memory_space<vmem>>, vector<2x128xf32>
    %c0_40 = arith.constant 0 : index
    %c0_41 = arith.constant 0 : index
    %83 = vector.load %arg3[%c0_40, %c0_41] : memref<128x512xf32, #tpu.memory_space<vmem>>, vector<128x512xf32>
    %cst_42 = arith.constant dense<0.000000e+00> : vector<2x512xf32>
    %84 = tpu.matmul %81, %83, %cst_42 {dimension_numbers = #tpu.dot_dimension_numbers<[1], [0], [0], [1], [0, 0, 1, 1], [], []>} : vector<2x128xf32>, vector<128x512xf32>, vector<2x512xf32> -> vector<2x512xf32>
    %85 = arith.index_cast %c2_i32 : i32 to index
    %c0_43 = arith.constant 0 : index
    %c0_44 = arith.constant 0 : index
    %86 = vector.load %arg2[%85, %c0_43, %c0_44] : memref<3x2x512xf32, #tpu.memory_space<vmem>>, vector<1x2x512xf32>
    %87 = vector.shape_cast %86 : vector<1x2x512xf32> to vector<2x512xf32>
    %88 = arith.addf %84, %87 : vector<2x512xf32>
    %89 = vector.extract_strided_slice %88 {offsets = [0, 0], sizes = [2, 128], strides = [1, 1]} : vector<2x512xf32> to vector<2x128xf32>
    %90 = arith.negf %89 : vector<2x128xf32>
    %91 = math.exp %90 : vector<2x128xf32>
    %cst_45 = arith.constant 1.000000e+00 : f32
    %92 = vector.broadcast %cst_45 : f32 to vector<2x128xf32>
    %93 = arith.addf %92, %91 : vector<2x128xf32>
    %94 = arith.divf %92, %93 : vector<2x128xf32>
    %95 = vector.extract_strided_slice %88 {offsets = [0, 128], sizes = [2, 128], strides = [1, 1]} : vector<2x512xf32> to vector<2x128xf32>
    %96 = arith.negf %95 : vector<2x128xf32>
    %97 = math.exp %96 : vector<2x128xf32>
    %cst_46 = arith.constant 1.000000e+00 : f32
    %98 = vector.broadcast %cst_46 : f32 to vector<2x128xf32>
    %99 = arith.addf %98, %97 : vector<2x128xf32>
    %100 = arith.divf %98, %99 : vector<2x128xf32>
    %101 = vector.extract_strided_slice %88 {offsets = [0, 256], sizes = [2, 128], strides = [1, 1]} : vector<2x512xf32> to vector<2x128xf32>
    %102 = math.tanh %101 : vector<2x128xf32>
    %103 = vector.extract_strided_slice %88 {offsets = [0, 384], sizes = [2, 128], strides = [1, 1]} : vector<2x512xf32> to vector<2x128xf32>
    %104 = arith.negf %103 : vector<2x128xf32>
    %105 = math.exp %104 : vector<2x128xf32>
    %cst_47 = arith.constant 1.000000e+00 : f32
    %106 = vector.broadcast %cst_47 : f32 to vector<2x128xf32>
    %107 = arith.addf %106, %105 : vector<2x128xf32>
    %108 = arith.divf %106, %107 : vector<2x128xf32>
    %109 = arith.mulf %100, %82 : vector<2x128xf32>
    %110 = arith.mulf %94, %102 : vector<2x128xf32>
    %111 = arith.addf %109, %110 : vector<2x128xf32>
    %112 = math.tanh %111 : vector<2x128xf32>
    %113 = arith.mulf %108, %112 : vector<2x128xf32>
    %c0_48 = arith.constant 0 : index
    %c0_49 = arith.constant 0 : index
    %114 = vector.load %arg6[%c0_48, %c0_49] : memref<2x128xf32, #tpu.memory_space<vmem>>, vector<2x128xf32>
    tpu.vector_store %arg6[%c0_48, %c0_49], %111 {strides = array<i32>} : memref<2x128xf32, #tpu.memory_space<vmem>>, vector<2x128xf32>,
    %c0_50 = arith.constant 0 : index
    %c0_51 = arith.constant 0 : index
    %115 = vector.load %arg5[%c0_50, %c0_51] : memref<2x128xf32, #tpu.memory_space<vmem>>, vector<2x128xf32>
    tpu.vector_store %arg5[%c0_50, %c0_51], %113 {strides = array<i32>} : memref<2x128xf32, #tpu.memory_space<vmem>>, vector<2x128xf32>,
    %116 = arith.index_cast %c2_i32 : i32 to index
    %c0_52 = arith.constant 0 : index
    %c0_53 = arith.constant 0 : index
    %117 = vector.load %arg4[%116, %c0_52, %c0_53] : memref<3x2x128xf32, #tpu.memory_space<vmem>>, vector<1x2x128xf32>
    %118 = vector.shape_cast %117 : vector<1x2x128xf32> to vector<2x128xf32>
    %119 = vector.shape_cast %113 : vector<2x128xf32> to vector<1x2x128xf32>
    tpu.vector_store %arg4[%116, %c0_52, %c0_53], %119 {strides = array<i32>} : memref<3x2x128xf32, #tpu.memory_space<vmem>>, vector<1x2x128xf32>,
    %c3_i32 = arith.constant 3 : i32
    return
  }
  func.func @transform_0(%arg0: i32, %arg1: i32) -> (i32, i32, i32) {
    %c0_i32 = arith.constant 0 : i32
    %c0_i32_0 = arith.constant 0 : i32
    return %arg1, %arg0, %c0_i32 : i32, i32, i32
  }
  func.func @transform_1(%arg0: i32, %arg1: i32) -> (i32, i32) {
    %c0_i32 = arith.constant 0 : i32
    %c0_i32_0 = arith.constant 0 : i32
    %c0_i32_1 = arith.constant 0 : i32
    return %c0_i32, %c0_i32_0 : i32, i32
  }
  func.func @transform_2(%arg0: i32, %arg1: i32) -> (i32, i32, i32) {
    %c0_i32 = arith.constant 0 : i32
    %c0_i32_0 = arith.constant 0 : i32
    return %arg1, %arg0, %c0_i32 : i32, i32, i32
  }
}

</mosaic_0001>

<bundles_post_ra>
// kernel: tpu_custom_call.1
= control target key start
LH: loop header
LB: loop body
LE: loop exit
PB: predicated region body
PF: predicated region fallthrough
CT: control target
= control target key end

     0   :  { %7 = vsyncpa [#allocation5], 0  ;;  %s2022_s0 = inlined_call_operand.hbm [shape: f32[9,2,512], index: 0, kind: input, shape index: {}]   ;;  %s2023_s1 = inlined_call_operand.hbm [shape: f32[128,512], index: 1, kind: input, shape index: {}]   ;;  %s2024_s2 = inlined_call_operand.hbm [shape: f32[9,2,128], index: 2, kind: output, shape index: {}]  }
   0x1   :  { %9 = vsyncpa [#allocation5 + $0x1], 0 }
   0x2   :  { %10 = vsyncpa [#allocation8], 0 }
   0x3   :  { %11 = vsyncpa [#allocation6], 0 }
   0x4   :  { %13 = vsyncpa [#allocation6 + $0x1], 0  ;;  %s1624_s9 = smov 0   ;;  %s1626_s10 = smov 0  }
   0x5   :  { %s1628_s11 = smov 0   ;;  %s1630_s12 = smov 0  }
   0x6   :  { %s1632_s13 = smov 0   ;;  %s1634_s14 = smov 0  }
   0x7 LB: > { %s1093_s15 = sadd.s32 4294967295, %s1595_s14   ;;  %s1094_s16 = sadd.s32 4294967294, %s1595_s14   ;;  %s1595_s14 = sphi %s1634_s14, %s19_s14   ;;  %s1591_s13 = sphi %s1632_s13, %s2046_s13   ;;  %s1587_s12 = sphi %s1630_s12, %s2045_s12   ;;  %s1583_s11 = sphi %s1628_s11, %s2044_s11   ;;  %s1579_s10 = sphi %s1626_s10, %s2043_s10   ;;  %s1575_s9 = sphi %s1624_s9, %s2042_s9  }
   0x8   : > { %p53_p0 = scmp.ne.s32.totalorder %s1579_s10, %s1575_s9  ;;  %p1658_p1 = scmp.eq.s32.totalorder %s1093_s15, 0 }
   0x9   : > { %p1662_p2 = scmp.eq.s32.totalorder %s1093_s15, 2  ;;  %p106_p3 = scmp.eq.s32.totalorder %s1094_s16, 2 }
   0xa   : > { %s2029_s17 = scalar_select %p1658_p1, 1, 0 }
   0xb   : > { %s2030_s18 = scalar_select %p1662_p2, 1, 0 }
   0xc   : > { %p1668_p4 = por %p1658_p1, %p53_p0  ;;  %p1095_p5 = scmp.ge.s32.totalorder %s1595_s14, 1 }
   0xd   : > { %p1673_p6 = por %p106_p3, %p53_p0  ;;  %p113_p7 = scmp.lt.s32.totalorder %s1595_s14, 4 }
   0xe   : > { %s2031_s19 = scalar_select %p1668_p4, 1, 0 }
   0xf   : > { %s2032_s20 = scalar_select %p1673_p6, 1, 0 }
  0x10   : > { %p1678_p8 = pnand %p1095_p5, %p113_p7  ;;  %s1597_s22 = smov [#allocation7]  }
  0x11   : > { %s125_s23 = sshll.u32 %s1597_s22, 4  ;;  %s28_s25 = sadd.s32 1, %s1591_s13  ;;  %s126_s23 = int_to_ptr.vmem [resolvable:$true] %s125_s23 }
  0x12   : > { %s2033_s21 = scalar_select %p1678_p8, 1, 0 }
  0x13   : > { %p1326_p9 = pneg %p1678_p8  ;;  %s1451_s28 = scalar_lea.hbm %s2023_s1, 8192 }
  0x14   : > { %p1452_p11 = scmp.ne.s32.totalorder %s2023_s1, %s1451_s28  ;;  %p1458_p3 = scmp.lt.u32.totalorder %s1451_s28, %s2023_s1 }
  0x15   : > { %p1686_p10 = pnand %p1326_p9, %p1658_p1 }
  0x17   : > { %p1453_p12 = pneg %p1686_p10 }
  0x19   : > { %p1454_p13 = pnand %p1453_p12, %p1452_p11 }
  0x1b   : > { %p1455_p0 = pneg %p1454_p13 }
  0x1d   : > { %p1460_p5 = pnand %p1458_p3, %p1455_p0 }
  0x1f   : > { %1463 = shalt.err (!%p1460_p5)
}
  0x20   : > { %s1464_s5 = scalar_lea.vmem %s126_s23, 8192  ;;  %p1472_p1 = scmp.lt.s32.totalorder %s126_s23, %s126_s23 }
  0x21   : > { %p1465_p7 = scmp.ne.s32.totalorder %s126_s23, %s1464_s5  ;;  %p1473_p4 = scmp.lt.s32.totalorder %s1464_s5, %s1464_s5 }
  0x23   : > { %p1467_p9 = pnand %p1465_p7, %p1453_p12  ;;  %p1474_p8 = por %p1473_p4, %p1472_p1 }
  0x25   : > { %p1468_p6 = pneg %p1467_p9 }
  0x27   : > { %p1475_p2 = pnand %p1474_p8, %p1468_p6 }
  0x29   : > { %1478 = shalt.err (!%p1475_p2)
}
  0x2a   : > { %s1598_s6 = smov 512   ;;  %s1599_s7 = smov 32  }
  0x2b   : > { %1329 = dma.hbm_to_vmem [thread:$0]  (!%p1686_p10), %s2023_s1, 8192, %s126_s23, [#allocation8], %s1598_s6, %s1598_s6, %s1599_s7  }
  0x2c   : > { %p29_p1 = scmp.ge.s32.totalorder %s28_s25, 3  ;;  %s40_s16 = sadd.s32 1, %s1583_s11 }
  0x2d   : > { %p47_p2 = scmp.ne.s32.totalorder %s1583_s11, %s1579_s10  ;;  %p48_p4 = scmp.eq.s32.totalorder %s1595_s14, 0 }
  0x2e   : > { %s2048_s25 = smov (%p29_p1, %s28_s25), 0  ;;  %p2035_p8 = scmp.ne.s32.totalorder %s2030_s18, 0 }
  0x2f   : > { %p49_p6 = por %p48_p4, %p47_p2  ;;  %s35_s26 = ssub.s32 %s1591_s13, %s2048_s25 }
  0x30   : > { %p1715_p11 = por %p2035_p8, %p47_p2  ;;  %p1339_p12 = scmp.lt.s32.totalorder %s1595_s14, 3 }
  0x31   : > { %p38_p13 = scmp.eq.s32.totalorder %s35_s26, 0  ;;  %s139_s24 = sand.u32 1, %s1583_s11  }
  0x32   : > { %s1315_s27 = smul.u32 24, %s139_s24  ;;  %p1727_p10 = pnand %p1339_p12, %p49_p6 }
  0x33   : > { %s1724_s28 = scalar_select %p38_p13, %s1583_s11, %s40_s16  }
  0x34   : > { %s1122_s23 = smul.u32 384, %s1591_s13  ;;  %s143_s29 = scalar_lea.vmem [#allocation4], %s1315_s27 }
  0x35   : > { %s153_s30 = sshll.u32 %s143_s29, 4  ;;  %s1738_s6 = scalar_lea.sflag [#allocation5], %s139_s24  ;;  %s1736_s30 = int_to_ptr.vmem [resolvable:$true] %s153_s30 }
  0x36   : > { %s1734_s5 = scalar_lea.hbm %s2022_s0, %s1122_s23  ;;  %p1481_p3 = pneg %p1727_p10 }
  0x37   : > { %s1479_s7 = scalar_lea.hbm %s1734_s5, 384  ;;  %s1484_s16 = scalar_lea.hbm %s2022_s0, 1152 }
  0x38   : > { %p1480_p0 = scmp.ne.s32.totalorder %s1734_s5, %s1479_s7  ;;  %p1485_p9 = scmp.lt.u32.totalorder %s1734_s5, %s2022_s0 }
  0x39   : > { %p1486_p1 = scmp.lt.u32.totalorder %s1484_s16, %s1479_s7  ;;  %p1488_p4 = scmp.lt.u32.totalorder %s1479_s7, %s1734_s5 }
  0x3a   : > { %p1482_p5 = pnand %p1481_p3, %p1480_p0 }
  0x3b   : > { %p1487_p2 = por %p1486_p1, %p1485_p9 }
  0x3c   : > { %p1483_p7 = pneg %p1482_p5 }
  0x3d   : > { %p1489_p6 = por %p1488_p4, %p1487_p2 }
  0x3f   : > { %p1490_p8 = pnand %p1489_p6, %p1483_p7 }
  0x41   : > { %1493 = shalt.err (!%p1490_p8)
}
  0x42   : > { %s1494_s24 = scalar_lea.vmem %s1736_s30, 384  ;;  %s1600_s23 = smov [#allocation4]  }
  0x43   : > { %p1495_p12 = scmp.ne.s32.totalorder %s1736_s30, %s1494_s24  ;;  %s1499_s29 = sshll.u32 %s1600_s23, 4  ;;  %s1500_s29 = int_to_ptr.vmem [resolvable:$false] %s1499_s29 }
  0x44   : > { %s1501_s4 = scalar_lea.vmem %s1500_s29, 768  ;;  %p1502_p5 = scmp.lt.s32.totalorder %s1736_s30, %s1500_s29 }
  0x45   : > { %p1497_p13 = pnand %p1495_p12, %p1481_p3  ;;  %p1503_p9 = scmp.lt.s32.totalorder %s1501_s4, %s1494_s24 }
  0x47   : > { %p1498_p0 = pneg %p1497_p13  ;;  %p1504_p1 = por %p1503_p9, %p1502_p5 }
  0x49   : > { %p1505_p2 = pnand %p1504_p1, %p1498_p0 }
  0x4b   : > { %1508 = shalt.err (!%p1505_p2)
}
  0x4c   : > { %s1601_s18 = smov 128   ;;  %s1602_s7 = smov 8  }
  0x4d   : > { %1333 = dma.hbm_to_vmem [thread:$0]  (!%p1727_p10), %s1734_s5, 384, %s1736_s30, %s1738_s6, %s1601_s18, %s1601_s18, %s1602_s7  }
  0x4e   : > { %p2038_p3 = scmp.ne.s32.totalorder %s2033_s21, 0 }
  0x4f   : > { %s1769_s8 = sand.u32 (!%p2038_p3), 1, %s1579_s10   ;;  %p2039_p7 = scmp.ne.s32.totalorder (!%p2038_p3), %s2031_s19, 0 }
  0x50   : > { %165 = sbr.rel (%p2038_p3) target bundleno = 941 (0x3ad), region = 28  ;;  %s168_s16 = scalar_lea.sflag (!%p2038_p3), [#allocation5], %s1769_s8 }
  0x51   : > { %s1316_s15 = smul.u32 (!%p2038_p3), 24, %s1769_s8 }
  0x53   : > { %s1773_s26 = scalar_lea.vmem (!%p2038_p3), [#allocation4], %s1316_s15 }
  0x57   : > { %1562 = dma.done.wait (%p2039_p7), %s168_s16, 384  }
  0x58   : > { %1564 = vsyncadd (%p2039_p7), %s168_s16, 4294966912  ;;  %p2040_p10 = scmp.ne.s32.totalorder %s2029_s17, 0 }
  0x5a   : > { %1566 = dma.done.wait (%p2040_p10), [#allocation8], 8192  }
  0x5b   : > { %1568 = vsyncadd (%p2040_p10), [#allocation8], 4294959104  ;;  %s1317_s21 = smul.u32 6, %s1769_s8  ;;  %p1102_p4 = scmp.ne.s32.totalorder %s1587_s12, 0 }
  0x5c   : > { %v1603_v0 = vmov (!%p1102_p4), 0.0  }
  0x5d   : > { %s1784_s30 = scalar_lea.vmem [#allocation9], %s1317_s21  ;;  %201 = sbr.rel (%p1102_p4) target bundleno = 100 (0x64), region = 40  ;;  %202 = vst [vmem:[#allocation2] sm:$0x3] (!%p1102_p4), %v1603_v0  ;;  %203 = vst [vmem:[#allocation3] sm:$0x3] (!%p1102_p4), %v1603_v0 }
  0x64 PF: > { %v207_v1 = vld [vmem:[#allocation7 + $0x8] sm:$0xff]  ;;  %v206_v3 = vld [vmem:[#allocation7] sm:$0xff]  ;;  %v1604_v8 = vmov 0.0   ;;  %v209_v20 = vld [vmem:[#allocation7 + $0x18] sm:$0xff]  ;;  %s1121_s17 = smul.u32 96, %s1587_s12  ;;  %s997_s19 = sshll.u32 %s1784_s30, 4  ;;  %s1973_s19 = int_to_ptr.vmem [resolvable:$true] %s997_s19 }
  0x65   : > { %v211_v2 = vld [vmem:[#allocation7 + $0x28] sm:$0xff]  ;;  %v210_v5 = vld [vmem:[#allocation7 + $0x20] sm:$0xff]  ;;  %357 = vmatprep.mubr.f32.mxu0 %v1604_v8  ;;  %428 = vmatprep.mubr.f32.mxu1 %v1604_v8  ;;  %v213_v21 = vld [vmem:[#allocation7 + $0x38] sm:$0xff]  ;;  %s983_s27 = scalar_lea.sflag [#allocation6], %s1769_s8  ;;  %s1509_s24 = scalar_lea.vmem %s1973_s19, 96 }
  0x66   : > { %v1787_v4 = vpack.c.bf16 %v211_v2, %v207_v1  ;;  %v215_v6 = vld [vmem:[#allocation7 + $0x48] sm:$0xff]  ;;  %v1791_v9 = vpack.c.bf16 %v210_v5, %v206_v3  ;;  %v214_v11 = vld [vmem:[#allocation7 + $0x40] sm:$0xff]  ;;  %v1802_v23 = vpack.c.bf16 %v213_v21, %v209_v20  ;;  %v208_v24 = vld [vmem:[#allocation7 + $0x10] sm:$0xff]  ;;  %s1971_s6 = scalar_lea.hbm %s2024_s2, %s1121_s17  ;;  %p1510_p6 = scmp.ne.s32.totalorder %s1973_s19, %s1509_s24 }
  0x67   : > { %v219_v7 = vld [vmem:[#allocation7 + $0x68] sm:$0xff]  ;;  %v218_v12 = vld [vmem:[#allocation7 + $0x60] sm:$0xff]  ;;  %v212_v25 = vld [vmem:[#allocation7 + $0x30] sm:$0xff]  ;;  %s1606_s12 = smov [#allocation9]  }
  0x68   : > { %v1793_v10 = vpack.c.bf16 %v219_v7, %v215_v6  ;;  %v223_v13 = vld [vmem:[#allocation7 + $0x88] sm:$0xff]  ;;  %1124 = vmatprep.subr.bf16.mxu0 %v1787_v4  ;;  %v1797_v15 = vpack.c.bf16 %v218_v12, %v214_v11  ;;  %v222_v16 = vld [vmem:[#allocation7 + $0x80] sm:$0xff]  ;;  %v1804_v26 = vpack.c.bf16 %v212_v25, %v208_v24  ;;  %1156 = vmatprep.subr.bf16.mxu1 %v1802_v23  ;;  %v217_v28 = vld [vmem:[#allocation7 + $0x58] sm:$0xff]  ;;  %p1511_p8 = pnand %p1510_p6, %p1715_p11  ;;  %s1513_s23 = sshll.u32 %s1606_s12, 4  ;;  %s1514_s23 = int_to_ptr.vmem [resolvable:$false] %s1513_s23 }
  0x69   : > { %v227_v14 = vld [vmem:[#allocation7 + $0xa8] sm:$0xff]  ;;  %1126 = vmatpush1.bf16.msra.mxu0 %v1791_v9  ;;  %v226_v17 = vld [vmem:[#allocation7 + $0xa0] sm:$0xff]  ;;  %v221_v29 = vld [vmem:[#allocation7 + $0x78] sm:$0xff]  ;;  %s1515_s29 = scalar_lea.vmem %s1514_s23, 192  ;;  %p1516_p13 = scmp.lt.s32.totalorder %s1973_s19, %s1514_s23 }
  0x6a   : > { %1128 = vmatprep.subr.bf16.mxu0 %v1793_v10  ;;  %v1800_v18 = vpack.c.bf16 %v227_v14, %v223_v13  ;;  %v231_v19 = vld [vmem:[#allocation7 + $0xc8] sm:$0xff]  ;;  %v1807_v27 = vpack.c.bf16 %v226_v17, %v222_v16  ;;  %v216_v30 = vld [vmem:[#allocation7 + $0x50] sm:$0xff]  ;;  %v230_v32 = vld [vmem:[#allocation7 + $0xc0] sm:$0xff]  ;;  %1158 = vmatpush1.bf16.msra.mxu1 %v1804_v26  ;;  %v1814_v34 = vpack.c.bf16 %v221_v29, %v217_v28  ;;  %p1512_p12 = pneg %p1511_p8  ;;  %p1517_p0 = scmp.lt.s32.totalorder %s1515_s29, %s1509_s24 }
  0x6b   : > { %v235_v22 = vld [vmem:[#allocation7 + $0xe8] sm:$0xff]  ;;  %v234_v33 = vld [vmem:[#allocation7 + $0xe0] sm:$0xff]  ;;  %v220_v35 = vld [vmem:[#allocation7 + $0x70] sm:$0xff] }
  0x6c   : > { %v1811_v31 = vpack.c.bf16 %v235_v22, %v231_v19  ;;  %v239_v36 = vld [vmem:[#allocation7 + $0x108] sm:$0xff]  ;;  %v1816_v38 = vpack.c.bf16 %v220_v35, %v216_v30  ;;  %v225_v39 = vld [vmem:[#allocation7 + $0x98] sm:$0xff]  ;;  %1160 = vmatprep.subr.bf16.mxu1 %v1814_v34  ;;  %v224_v41 = vld [vmem:[#allocation7 + $0x90] sm:$0xff]  ;;  %v1820_v43 = vpack.c.bf16 %v234_v33, %v230_v32  ;;  %p1518_p5 = por %p1517_p0, %p1516_p13 }
  0x6d   : > { %1130 = vmatpush1.bf16.msra.mxu0 %v1797_v15  ;;  %v243_v37 = vld [vmem:[#allocation7 + $0x128] sm:$0xff]  ;;  %v229_v40 = vld [vmem:[#allocation7 + $0xb8] sm:$0xff]  ;;  %v228_v42 = vld [vmem:[#allocation7 + $0xb0] sm:$0xff] }
  0x6e   : > { %1132 = vmatprep.subr.bf16.mxu0 %v1800_v18  ;;  %v238_v44 = vld [vmem:[#allocation7 + $0x100] sm:$0xff]  ;;  %v1822_v46 = vpack.c.bf16 %v229_v40, %v225_v39  ;;  %v1825_v47 = vpack.c.bf16 %v243_v37, %v239_v36  ;;  %1162 = vmatpush1.bf16.msra.mxu1 %v1816_v38  ;;  %v247_v48 = vld [vmem:[#allocation7 + $0x148] sm:$0xff]  ;;  %v1828_v49 = vpack.c.bf16 %v228_v42, %v224_v41  ;;  %v233_v50 = vld [vmem:[#allocation7 + $0xd8] sm:$0xff]  ;;  %p1519_p9 = pnand %p1518_p5, %p1512_p12 }
  0x6f   : > { %v242_v45 = vld [vmem:[#allocation7 + $0x120] sm:$0xff]  ;;  %v237_v51 = vld [vmem:[#allocation7 + $0xf8] sm:$0xff]  ;;  %v251_v52 = vld [vmem:[#allocation7 + $0x168] sm:$0xff] }
  0x70   : > { %1164 = vmatprep.subr.bf16.mxu1 %v1822_v46  ;;  %v1831_v53 = vpack.c.bf16 %v237_v51, %v233_v50  ;;  %v232_v54 = vld [vmem:[#allocation7 + $0xd0] sm:$0xff]  ;;  %v1834_v56 = vpack.c.bf16 %v242_v45, %v238_v44  ;;  %v241_v57 = vld [vmem:[#allocation7 + $0x118] sm:$0xff]  ;;  %v1837_v59 = vpack.c.bf16 %v251_v52, %v247_v48  ;;  %v246_v60 = vld [vmem:[#allocation7 + $0x140] sm:$0xff]  ;;  %v1605_v51 = vmov 1983009808  }
  0x71   : > { %1134 = vmatpush1.bf16.msra.mxu0 %v1807_v27  ;;  %v236_v55 = vld [vmem:[#allocation7 + $0xf0] sm:$0xff]  ;;  %v245_v58 = vld [vmem:[#allocation7 + $0x138] sm:$0xff]  ;;  %v250_v61 = vld [vmem:[#allocation7 + $0x160] sm:$0xff]  ;;  %v274_v52 = vunpack.c.l.s4 %v1605_v51 }
  0x72   : > { %1136 = vmatprep.subr.bf16.mxu0 %v1811_v31  ;;  %1166 = vmatpush1.bf16.msra.mxu1 %v1828_v49  ;;  %v255_v62 = vld [vmem:[#allocation7 + $0x188] sm:$0xff]  ;;  %v1840_v63 = vpack.c.bf16 %v236_v55, %v232_v54  ;;  %v1843_v1 = vpack.c.bf16 %v245_v58, %v241_v57  ;;  %v240_v2 = vld [vmem:[#allocation7 + $0x110] sm:$0xff]  ;;  %v249_v5 = vld [vmem:[#allocation7 + $0x158] sm:$0xff]  ;;  %v1846_v7 = vpack.c.bf16 %v250_v61, %v246_v60  ;;  %v276_v54 = vlaneseq }
  0x73   : > { %v259_v0 = vld [vmem:[#allocation7 + $0x1a8] sm:$0xff]  ;;  %1168 = vmatprep.subr.bf16.mxu1 %v1831_v53  ;;  %v244_v3 = vld [vmem:[#allocation7 + $0x130] sm:$0xff]  ;;  %v253_v6 = vld [vmem:[#allocation7 + $0x178] sm:$0xff]  ;;  %v275_v55 = vunpack.c.0.s8 %v274_v52 }
  0x74   : > { %v1849_v11 = vpack.c.bf16 %v259_v0, %v255_v62  ;;  %v254_v12 = vld [vmem:[#allocation7 + $0x180] sm:$0xff]  ;;  %v263_v14 = vld [vmem:[#allocation7 + $0x1c8] sm:$0xff]  ;;  %v1852_v16 = vpack.c.bf16 %v244_v3, %v240_v2  ;;  %v1855_v19 = vpack.c.bf16 %v253_v6, %v249_v5  ;;  %v248_v20 = vld [vmem:[#allocation7 + $0x150] sm:$0xff]  ;;  %v277_v57 = vshrl.u32 %v276_v54, 7 }
  0x75   : > { %1138 = vmatpush1.bf16.msra.mxu0 %v1820_v43  ;;  %v258_v13 = vld [vmem:[#allocation7 + $0x1a0] sm:$0xff]  ;;  %v267_v17 = vld [vmem:[#allocation7 + $0x1e8] sm:$0xff]  ;;  %v252_v21 = vld [vmem:[#allocation7 + $0x170] sm:$0xff] }
  0x76   : > { %1140 = vmatprep.subr.bf16.mxu0 %v1825_v47  ;;  %1170 = vmatpush1.bf16.msra.mxu1 %v1840_v63  ;;  %v257_v22 = vld [vmem:[#allocation7 + $0x198] sm:$0xff]  ;;  %v1858_v25 = vpack.c.bf16 %v258_v13, %v254_v12  ;;  %v1861_v28 = vpack.c.bf16 %v267_v17, %v263_v14  ;;  %v262_v29 = vld [vmem:[#allocation7 + $0x1c0] sm:$0xff]  ;;  %v1864_v32 = vpack.c.bf16 %v252_v21, %v248_v20  ;;  %v256_v35 = vld [vmem:[#allocation7 + $0x190] sm:$0xff] }
  0x77   : > { %1172 = vmatprep.subr.bf16.mxu1 %v1843_v1  ;;  %v261_v24 = vld [vmem:[#allocation7 + $0x1b8] sm:$0xff]  ;;  %v266_v30 = vld [vmem:[#allocation7 + $0x1e0] sm:$0xff]  ;;  %v260_v36 = vld [vmem:[#allocation7 + $0x1b0] sm:$0xff]  ;;  %v1921_v58 = vsub.s32 %v275_v55, %v277_v57 }
  0x78   : > { %v1867_v33 = vpack.c.bf16 %v261_v24, %v257_v22  ;;  %v265_v37 = vld [vmem:[#allocation7 + $0x1d8] sm:$0xff]  ;;  %v1870_v40 = vpack.c.bf16 %v266_v30, %v262_v29  ;;  %v1874_v41 = vpack.c.bf16 %v260_v36, %v256_v35  ;;  %v264_v44 = vld [vmem:[#allocation7 + $0x1d0] sm:$0xff]  ;;  %v204_v48 = vld [vmem:[#allocation2] sm:$0x3] }
  0x79   : > { %1142 = vmatpush1.bf16.msra.mxu0 %v1834_v56  ;;  %v269_v39 = vld [vmem:[#allocation7 + $0x1f8] sm:$0xff]  ;;  %v268_v45 = vld [vmem:[#allocation7 + $0x1f0] sm:$0xff] }
  0x7a   : > { %1144 = vmatprep.subr.bf16.mxu0 %v1837_v59  ;;  %1174 = vmatpush1.bf16.msra.mxu1 %v1852_v16  ;;  %v1877_v42 = vpack.c.bf16 %v269_v39, %v265_v37  ;;  %v1881_v50 = vpack.c.bf16 %v268_v45, %v264_v44  ;;  %v270_v60 = vld [vmem:[%s1773_s26] sm:$0xff] }
  0x7b   : > { %1176 = vmatprep.subr.bf16.mxu1 %v1855_v19  ;;  %v279_v61 = vrot.slane %v270_v60, %v1921_v58  ;;  %v272_v62 = vcombine.high %v270_v60, %v270_v60  ;;  %v205_v39 = vld [vmem:[#allocation3] sm:$0x3] }
  0x7d   : > { %1146 = vmatpush1.bf16.msra.mxu0 %v1846_v7  ;;  %v287_v0 = vcombine.high %v279_v61, %v279_v61 }
  0x7e   : > { %1148 = vmatprep.subr.bf16.mxu0 %v1849_v11  ;;  %1178 = vmatpush1.bf16.msra.mxu1 %v1864_v32 }
  0x7f   : > { %1180 = vmatprep.subr.bf16.mxu1 %v1867_v33 }
  0x81   : > { %1150 = vmatpush1.bf16.msra.mxu0 %v1858_v25 }
  0x82   : > { %1152 = vmatprep.subr.bf16.mxu0 %v1861_v28  ;;  %1182 = vmatpush1.bf16.msra.mxu1 %v1874_v41 }
  0x83   : > { %1184 = vmatprep.subr.bf16.mxu1 %v1877_v42 }
  0x85   : > { %1154 = vmatpush1.bf16.msra.mxu0 %v1870_v40 }
  0x86   : > { %1188 = vmatprep.subr.bf16.mxu0 %v1787_v4  ;;  %1186 = vmatpush1.bf16.msra.mxu1 %v1881_v50 }
  0x87   : > { %1220 = vmatprep.subr.bf16.mxu1 %v1802_v23 }
  0x88   : > { %358 = vmatmul.mubr.f32.vlgmr.msra.gmra.mrb[0].mxu0 %v204_v48 }
  0x89   : > { %1190 = vmatpush1.bf16.msra.mxu0 %v1791_v9  ;;  %616 = vmatprep.mubr.f32.mxu0 %v1604_v8 }
  0x8a   : > { %1192 = vmatprep.subr.bf16.mxu0 %v1793_v10  ;;  %429 = vmatmul.mubr.f32.vlgmr.msra.gmra.mrb[0].mxu1 %v204_v48 }
  0x8b   : > { %1222 = vmatpush1.bf16.msra.mxu1 %v1804_v26  ;;  %687 = vmatprep.mubr.f32.mxu1 %v1604_v8 }
  0x8c   : > { %1224 = vmatprep.subr.bf16.mxu1 %v1814_v34 }
  0x8d   : > { %1194 = vmatpush1.bf16.msra.mxu0 %v1797_v15 }
  0x8e   : > { %1196 = vmatprep.subr.bf16.mxu0 %v1800_v18 }
  0x8f   : > { %1226 = vmatpush1.bf16.msra.mxu1 %v1816_v38 }
  0x90   : > { %1228 = vmatprep.subr.bf16.mxu1 %v1822_v46 }
  0x91   : > { %1198 = vmatpush1.bf16.msra.mxu0 %v1807_v27 }
  0x92   : > { %1200 = vmatprep.subr.bf16.mxu0 %v1811_v31 }
  0x93   : > { %1230 = vmatpush1.bf16.msra.mxu1 %v1828_v49 }
  0x94   : > { %1232 = vmatprep.subr.bf16.mxu1 %v1831_v53 }
  0x95   : > { %1202 = vmatpush1.bf16.msra.mxu0 %v1820_v43 }
  0x96   : > { %1204 = vmatprep.subr.bf16.mxu0 %v1825_v47 }
  0x97   : > { %1234 = vmatpush1.bf16.msra.mxu1 %v1840_v63 }
  0x98   : > { %1236 = vmatprep.subr.bf16.mxu1 %v1843_v1 }
  0x99   : > { %1206 = vmatpush1.bf16.msra.mxu0 %v1834_v56 }
  0x9a   : > { %1208 = vmatprep.subr.bf16.mxu0 %v1837_v59 }
  0x9b   : > { %1238 = vmatpush1.bf16.msra.mxu1 %v1852_v16 }
  0x9c   : > { %1240 = vmatprep.subr.bf16.mxu1 %v1855_v19 }
  0x9d   : > { %1210 = vmatpush1.bf16.msra.mxu0 %v1846_v7 }
  0x9e   : > { %1212 = vmatprep.subr.bf16.mxu0 %v1849_v11 }
  0x9f   : > { %1242 = vmatpush1.bf16.msra.mxu1 %v1864_v32 }
  0xa0   : > { %1244 = vmatprep.subr.bf16.mxu1 %v1867_v33 }
  0xa1   : > { %1214 = vmatpush1.bf16.msra.mxu0 %v1858_v25 }
  0xa2   : > { %1216 = vmatprep.subr.bf16.mxu0 %v1861_v28 }
  0xa3   : > { %1246 = vmatpush1.bf16.msra.mxu1 %v1874_v41 }
  0xa4   : > { %1248 = vmatprep.subr.bf16.mxu1 %v1877_v42 }
  0xa5   : > { %1218 = vmatpush1.bf16.msra.mxu0 %v1870_v40 }
  0xa6   : > { %1252 = vmatprep.subr.bf16.mxu0 %v1787_v4  ;;  %v286_v4 = vrot.slane %v272_v62, %v1921_v58 }
  0xa7   : > { %1250 = vmatpush1.bf16.msra.mxu1 %v1881_v50 }
  0xa8   : > { %1284 = vmatprep.subr.bf16.mxu1 %v1802_v23  ;;  %v288_v23 = vcombine.high %v286_v4, %v286_v4 }
 0x15b   : > { %v359_v2 = vpop.f32.mrb[0].mxu0 }
 0x15c   : > { %v360_v3 = vadd.f32 %v359_v2, %v279_v61  ;;  %v361_v5 = vpop.f32.mrb[1].mxu0  ;;  %v1111_v2 = vld [vmem:[%s1773_s26 + $0x10] sm:$0xff] }
 0x15d   : > { %v362_v6 = vadd.f32 %v361_v5, %v287_v0  ;;  %v430_v14 = vpop.f32.mrb[0].mxu1  ;;  %v791_v5 = vcombine.high %v1111_v2, %v1111_v2 }
 0x15e   : > { %v1103_v12 = vmul.f32 -1.442695, %v360_v3  ;;  %v432_v17 = vpop.f32.mrb[1].mxu1  ;;  %v431_v22 = vadd.f32 %v430_v14, %v286_v4  ;;  %v798_v3 = vrot.slane %v1111_v2, %v1921_v58 }
 0x15f   : > { %v1104_v13 = vmul.f32 -1.442695, %v362_v6  ;;  %v433_v20 = vadd.f32 %v432_v17, %v288_v23  ;;  %v805_v23 = vrot.slane %v791_v5, %v1921_v58 }
 0x160   : > { %1403 = vpow2.f32 %v1103_v12  ;;  %v806_v6 = vcombine.high %v798_v3, %v798_v3 }
 0x161   : > { %1405 = vpow2.f32 %v1104_v13  ;;  %v1105_v21 = vmul.f32 -1.442695, %v433_v20 }
 0x163   : > { %1407 = vpow2.f32 %v1105_v21 }
 0x164   : > { %1409 = vtanh.f32 %v431_v22 }
 0x16a   : > { %v1404_v24 = vpop.eup %1403 }
 0x16b   : > { %v1406_v29 = vpop.eup %1405  ;;  %v438_v30 = vadd.f32 1.0, %v1404_v24 }
 0x16c   : > { %v444_v35 = vadd.f32 1.0, %v1406_v29  ;;  %v807_v29 = vcombine.high %v805_v23, %v805_v23 }
 0x16d   : > { %1411 = vrcp.f32 %v438_v30  ;;  %v1408_v36 = vpop.eup %1407 }
 0x16e   : > { %1413 = vrcp.f32 %v444_v35  ;;  %v1410_v37 = vpop.eup %1409  ;;  %v451_v45 = vadd.f32 1.0, %v1408_v36 }
 0x170   : > { %1415 = vrcp.f32 %v451_v45 }
 0x177   : > { %v1412_v44 = vpop.eup %1411 }
 0x178   : > { %v1414_v48 = vpop.eup %1413  ;;  %v455_v51 = vmul.f32 %v1412_v44, %v1410_v37 }
 0x179   : > { %v454_v52 = vmul.f32 %v1414_v48, %v205_v39 }
 0x17a   : > { %v1416_v55 = vpop.eup %1415 }
 0x17b   : > { %v456_v54 = vadd.f32 %v455_v51, %v454_v52 }
 0x17d   : > { %1417 = vtanh.f32 %v456_v54  ;;  %459 = vst [vmem:[#allocation3] sm:$0x3] %v456_v54 }
 0x187   : > { %v1418_v57 = vpop.eup %1417 }
 0x188   : > { %v458_v60 = vmul.f32 %v1418_v57, %v1416_v55 }
 0x18a   : > { %460 = vst [vmem:[#allocation2] sm:$0x3] %v458_v60  ;;  %461 = vst [vmem:[%s1784_s30] sm:$0x3] %v458_v60 }
 0x191   : > { %v462_v61 = vld [vmem:[#allocation2] sm:$0x3] }
 0x192   : > { %617 = vmatmul.mubr.f32.vlgmr.msra.gmra.mrb[2].mxu0 %v462_v61  ;;  %688 = vmatmul.mubr.f32.vlgmr.msra.gmra.mrb[2].mxu1 %v462_v61 }
 0x193   : > { %1254 = vmatpush1.bf16.msra.mxu0 %v1791_v9  ;;  %1286 = vmatpush1.bf16.msra.mxu1 %v1804_v26 }
 0x194   : > { %1256 = vmatprep.subr.bf16.mxu0 %v1793_v10  ;;  %1288 = vmatprep.subr.bf16.mxu1 %v1814_v34 }
 0x195   : > { %876 = vmatprep.mubr.f32.mxu0 %v1604_v8  ;;  %947 = vmatprep.mubr.f32.mxu1 %v1604_v8  ;;  %v1106_v8 = vld [vmem:[%s1773_s26 + $0x8] sm:$0xff] }
 0x196   : > { %v538_v9 = vrot.slane %v1106_v8, %v1921_v58  ;;  %v531_v10 = vcombine.high %v1106_v8, %v1106_v8 }
 0x197   : > { %1258 = vmatpush1.bf16.msra.mxu0 %v1797_v15  ;;  %1290 = vmatpush1.bf16.msra.mxu1 %v1816_v38 }
 0x198   : > { %1260 = vmatprep.subr.bf16.mxu0 %v1800_v18  ;;  %1292 = vmatprep.subr.bf16.mxu1 %v1822_v46  ;;  %v546_v15 = vcombine.high %v538_v9, %v538_v9  ;;  %v545_v26 = vrot.slane %v531_v10, %v1921_v58 }
 0x19b   : > { %1262 = vmatpush1.bf16.msra.mxu0 %v1807_v27  ;;  %1294 = vmatpush1.bf16.msra.mxu1 %v1828_v49  ;;  %v547_v49 = vcombine.high %v545_v26, %v545_v26 }
 0x19c   : > { %1264 = vmatprep.subr.bf16.mxu0 %v1811_v31  ;;  %1296 = vmatprep.subr.bf16.mxu1 %v1831_v53 }
 0x19f   : > { %1266 = vmatpush1.bf16.msra.mxu0 %v1820_v43  ;;  %1298 = vmatpush1.bf16.msra.mxu1 %v1840_v63 }
 0x1a0   : > { %1268 = vmatprep.subr.bf16.mxu0 %v1825_v47  ;;  %1300 = vmatprep.subr.bf16.mxu1 %v1843_v1 }
 0x1a3   : > { %1270 = vmatpush1.bf16.msra.mxu0 %v1834_v56  ;;  %1302 = vmatpush1.bf16.msra.mxu1 %v1852_v16 }
 0x1a4   : > { %1272 = vmatprep.subr.bf16.mxu0 %v1837_v59  ;;  %1304 = vmatprep.subr.bf16.mxu1 %v1855_v19 }
 0x1a7   : > { %1274 = vmatpush1.bf16.msra.mxu0 %v1846_v7  ;;  %1306 = vmatpush1.bf16.msra.mxu1 %v1864_v32 }
 0x1a8   : > { %1276 = vmatprep.subr.bf16.mxu0 %v1849_v11  ;;  %1308 = vmatprep.subr.bf16.mxu1 %v1867_v33  ;;  %v463_v33 = vld [vmem:[#allocation3] sm:$0x3] }
 0x1ab   : > { %1278 = vmatpush1.bf16.msra.mxu0 %v1858_v25  ;;  %1310 = vmatpush1.bf16.msra.mxu1 %v1874_v41 }
 0x1ac   : > { %1280 = vmatprep.subr.bf16.mxu0 %v1861_v28  ;;  %1312 = vmatprep.subr.bf16.mxu1 %v1877_v42 }
 0x1af   : > { %1282 = vmatpush1.bf16.msra.mxu0 %v1870_v40  ;;  %1314 = vmatpush1.bf16.msra.mxu1 %v1881_v50 }
 0x265   : > { %v618_v18 = vpop.f32.mrb[2].mxu0  ;;  %v689_v27 = vpop.f32.mrb[2].mxu1 }
 0x266   : > { %v619_v31 = vadd.f32 %v618_v18, %v538_v9  ;;  %v620_v34 = vpop.f32.mrb[3].mxu0  ;;  %v691_v38 = vpop.f32.mrb[3].mxu1  ;;  %v690_v59 = vadd.f32 %v689_v27, %v545_v26 }
 0x267   : > { %v621_v43 = vadd.f32 %v620_v34, %v546_v15  ;;  %v692_v53 = vadd.f32 %v691_v38, %v547_v49 }
 0x268   : > { %v1107_v46 = vmul.f32 -1.442695, %v619_v31 }
 0x269   : > { %v1108_v47 = vmul.f32 -1.442695, %v621_v43  ;;  %v1109_v56 = vmul.f32 -1.442695, %v692_v53 }
 0x26a   : > { %1419 = vpow2.f32 %v1107_v46 }
 0x26b   : > { %1421 = vpow2.f32 %v1108_v47 }
 0x26c   : > { %1423 = vpow2.f32 %v1109_v56 }
 0x26d   : > { %1425 = vtanh.f32 %v690_v59 }
 0x274   : > { %v1420_v63 = vpop.eup %1419 }
 0x275   : > { %v1422_v1 = vpop.eup %1421  ;;  %v697_v7 = vadd.f32 1.0, %v1420_v63 }
 0x276   : > { %v703_v11 = vadd.f32 1.0, %v1422_v1  ;;  %v1424_v16 = vpop.eup %1423 }
 0x277   : > { %1427 = vrcp.f32 %v697_v7  ;;  %v1426_v19 = vpop.eup %1425  ;;  %v710_v40 = vadd.f32 1.0, %v1424_v16 }
 0x278   : > { %1429 = vrcp.f32 %v703_v11 }
 0x279   : > { %1431 = vrcp.f32 %v710_v40 }
 0x281   : > { %v1428_v25 = vpop.eup %1427 }
 0x282   : > { %v1430_v28 = vpop.eup %1429  ;;  %v714_v32 = vmul.f32 %v1428_v25, %v1426_v19 }
 0x283   : > { %v713_v41 = vmul.f32 %v1430_v28, %v463_v33  ;;  %v1432_v50 = vpop.eup %1431 }
 0x285   : > { %v715_v42 = vadd.f32 %v714_v32, %v713_v41 }
 0x287   : > { %1433 = vtanh.f32 %v715_v42  ;;  %718 = vst [vmem:[#allocation3] sm:$0x3] %v715_v42 }
 0x28e   : > { %v723_v55 = vld [vmem:[#allocation3] sm:$0x3] }
 0x291   : > { %v1434_v62 = vpop.eup %1433 }
 0x292   : > { %v717_v0 = vmul.f32 %v1434_v62, %v1432_v50 }
 0x294   : > { %719 = vst [vmem:[#allocation2] sm:$0x3] %v717_v0  ;;  %1110 = vst [vmem:[%s1784_s30 + $0x2] sm:$0x3] %v717_v0 }
 0x29b   : > { %v722_v4 = vld [vmem:[#allocation2] sm:$0x3] }
 0x29c   : > { %877 = vmatmul.mubr.f32.vlgmr.msra.gmra.mrb[4].mxu0 %v722_v4  ;;  %948 = vmatmul.mubr.f32.vlgmr.msra.gmra.mrb[4].mxu1 %v722_v4 }
 0x36f   : > { %v878_v12 = vpop.f32.mrb[4].mxu0  ;;  %v949_v13 = vpop.f32.mrb[4].mxu1 }
 0x370   : > { %v879_v14 = vadd.f32 %v878_v12, %v798_v3  ;;  %v880_v17 = vpop.f32.mrb[5].mxu0  ;;  %v951_v20 = vpop.f32.mrb[5].mxu1  ;;  %v950_v36 = vadd.f32 %v949_v13, %v805_v23 }
 0x371   : > { %v881_v21 = vadd.f32 %v880_v17, %v806_v6  ;;  %v952_v30 = vadd.f32 %v951_v20, %v807_v29 }
 0x372   : > { %v1112_v22 = vmul.f32 -1.442695, %v879_v14 }
 0x373   : > { %v1113_v24 = vmul.f32 -1.442695, %v881_v21  ;;  %v1114_v35 = vmul.f32 -1.442695, %v952_v30 }
 0x374   : > { %1435 = vpow2.f32 %v1112_v22 }
 0x375   : > { %1437 = vpow2.f32 %v1113_v24 }
 0x376   : > { %1439 = vpow2.f32 %v1114_v35 }
 0x377   : > { %1441 = vtanh.f32 %v950_v36 }
 0x37e   : > { %v1436_v37 = vpop.eup %1435 }
 0x37f   : > { %v1438_v39 = vpop.eup %1437  ;;  %v957_v44 = vadd.f32 1.0, %v1436_v37 }
 0x380   : > { %v963_v58 = vadd.f32 1.0, %v1438_v39  ;;  %v1440_v45 = vpop.eup %1439 }
 0x381   : > { %1443 = vrcp.f32 %v957_v44  ;;  %v1442_v48 = vpop.eup %1441  ;;  %v970_v57 = vadd.f32 1.0, %v1440_v45 }
 0x382   : > { %1445 = vrcp.f32 %v963_v58 }
 0x383   : > { %1447 = vrcp.f32 %v970_v57 }
 0x38b   : > { %v1444_v51 = vpop.eup %1443 }
 0x38c   : > { %v1446_v52 = vpop.eup %1445  ;;  %v974_v54 = vmul.f32 %v1444_v51, %v1442_v48 }
 0x38d   : > { %v973_v60 = vmul.f32 %v1446_v52, %v723_v55  ;;  %v1448_v8 = vpop.eup %1447 }
 0x38f   : > { %v975_v61 = vadd.f32 %v974_v54, %v973_v60 }
 0x391   : > { %1449 = vtanh.f32 %v975_v61  ;;  %978 = vst [vmem:[#allocation3] sm:$0x3] %v975_v61 }
 0x39b   : > { %v1450_v9 = vpop.eup %1449 }
 0x39c   : > { %v977_v10 = vmul.f32 %v1450_v9, %v1448_v8 }
 0x39e   : > { %979 = vst [vmem:[#allocation2] sm:$0x3] %v977_v10  ;;  %1115 = vst [vmem:[%s1784_s30 + $0x4] sm:$0x3] %v977_v10 }
 0x39f   : > { %1522 = shalt.err (!%p1519_p9)
}
 0x3a0   : > { %s1523_s4 = scalar_lea.hbm %s1971_s6, 96  ;;  %s1527_s15 = scalar_lea.hbm %s2024_s2, 288 }
 0x3a1   : > { %p1524_p1 = scmp.ne.s32.totalorder %s1971_s6, %s1523_s4  ;;  %p1528_p7 = scmp.lt.u32.totalorder %s1971_s6, %s2024_s2 }
 0x3a2   : > { %p1529_p10 = scmp.lt.u32.totalorder %s1527_s15, %s1523_s4  ;;  %p1531_p6 = scmp.lt.u32.totalorder %s1523_s4, %s1971_s6 }
 0x3a3   : > { %p1525_p2 = pnand %p1524_p1, %p1715_p11 }
 0x3a4   : > { %p1530_p4 = por %p1529_p10, %p1528_p7 }
 0x3a5   : > { %p1526_p3 = pneg %p1525_p2 }
 0x3a6   : > { %p1532_p8 = por %p1531_p6, %p1530_p4 }
 0x3a8   : > { %p1533_p12 = pnand %p1532_p8, %p1526_p3 }
 0x3aa   : > { %1536 = shalt.err (!%p1533_p12)
}
 0x3ab   : > { %s1607_s21 = smov 32   ;;  %s1608_s30 = smov 2  }
 0x3ac   : > { %1324 = dma.vmem_to_hbm [thread:$0]  (%p1715_p11), %s1973_s19, 96, %s1971_s6, %s983_s27, %s1607_s21, %s1607_s21, %s1608_s30  }
 0x3ad PF: > { %p1341_p13 = scmp.ge.s32.totalorder %s1595_s14, 2  ;;  %s1012_s17 = sand.u32 1, %s1575_s9  }
 0x3ae   : > { %p2041_p0 = scmp.ne.s32.totalorder %s2032_s20, 0  ;;  %s1013_s3 = scalar_lea.sflag [#allocation6], %s1012_s17 }
 0x3b0   : > { %p1335_p5 = pnand %p1341_p13, %p2041_p0 }
 0x3b2   : > { %1570 = dma.done.wait (!%p1335_p5), %s1013_s3, 96  }
 0x3b3   : > { %1572 = vsyncadd (!%p1335_p5), %s1013_s3, 4294967200  ;;  %s19_s14 = sadd.s32 1, %s1595_s14   ;;  %s2042_s9 = smov %s1579_s10 }
 0x3b4   : > { %p16_p9 = scmp.ge.s32.totalorder %s19_s14, 5   ;;  %s2043_s10 = smov %s1583_s11 }
 0x3b5   : > { %s2044_s11 = smov %s1724_s28  ;;  %s2045_s12 = smov %s1591_s13 }
 0x3b6   : > { %s2046_s13 = smov %s2048_s25  ;;  %18 = sbr.rel (!%p16_p9) target bundleno = 7 (0x7), region = 85 }
 0x3bd   :  { %1018 = vsyncpa [#allocation5], 1 }
 0x3be   :  { %1020 = vsyncpa [#allocation5 + $0x1], 1 }
 0x3bf   :  { %1021 = vsyncpa [#allocation8], 1 }
 0x3c0   :  { %1022 = vsyncpa [#allocation6], 1 }
 0x3c1   :  { %1024 = vsyncpa [#allocation6 + $0x1], 1 }

// kernel: tpu_custom_call.1
= control target key start
LH: loop header
LB: loop body
LE: loop exit
PB: predicated region body
PF: predicated region fallthrough
CT: control target
= control target key end

     0   :  { %7 = vsyncpa [#allocation5], 0  ;;  %s2022_s0 = inlined_call_operand.hbm [shape: f32[9,2,512], index: 0, kind: input, shape index: {}]   ;;  %s2023_s1 = inlined_call_operand.hbm [shape: f32[128,512], index: 1, kind: input, shape index: {}]   ;;  %s2024_s2 = inlined_call_operand.hbm [shape: f32[9,2,128], index: 2, kind: output, shape index: {}]  }
   0x1   :  { %9 = vsyncpa [#allocation5 + $0x1], 0 }
   0x2   :  { %10 = vsyncpa [#allocation8], 0 }
   0x3   :  { %11 = vsyncpa [#allocation6], 0 }
   0x4   :  { %13 = vsyncpa [#allocation6 + $0x1], 0  ;;  %s1624_s9 = smov 0   ;;  %s1626_s10 = smov 0  }
   0x5   :  { %s1628_s11 = smov 0   ;;  %s1630_s12 = smov 0  }
   0x6   :  { %s1632_s13 = smov 0   ;;  %s1634_s14 = smov 0  }
   0x7 LB: > { %s1093_s15 = sadd.s32 4294967295, %s1595_s14   ;;  %s1094_s16 = sadd.s32 4294967294, %s1595_s14   ;;  %s1595_s14 = sphi %s1634_s14, %s19_s14   ;;  %s1591_s13 = sphi %s1632_s13, %s2046_s13   ;;  %s1587_s12 = sphi %s1630_s12, %s2045_s12   ;;  %s1583_s11 = sphi %s1628_s11, %s2044_s11   ;;  %s1579_s10 = sphi %s1626_s10, %s2043_s10   ;;  %s1575_s9 = sphi %s1624_s9, %s2042_s9  }
   0x8   : > { %p53_p0 = scmp.ne.s32.totalorder %s1579_s10, %s1575_s9  ;;  %p1658_p1 = scmp.eq.s32.totalorder %s1093_s15, 0 }
   0x9   : > { %p1662_p2 = scmp.eq.s32.totalorder %s1093_s15, 2  ;;  %p106_p3 = scmp.eq.s32.totalorder %s1094_s16, 2 }
   0xa   : > { %s2029_s17 = scalar_select %p1658_p1, 1, 0 }
   0xb   : > { %s2030_s18 = scalar_select %p1662_p2, 1, 0 }
   0xc   : > { %p1668_p4 = por %p1658_p1, %p53_p0  ;;  %p1095_p5 = scmp.ge.s32.totalorder %s1595_s14, 1 }
   0xd   : > { %p1673_p6 = por %p106_p3, %p53_p0  ;;  %p113_p7 = scmp.lt.s32.totalorder %s1595_s14, 4 }
   0xe   : > { %s2031_s19 = scalar_select %p1668_p4, 1, 0 }
   0xf   : > { %s2032_s20 = scalar_select %p1673_p6, 1, 0 }
  0x10   : > { %p1678_p8 = pnand %p1095_p5, %p113_p7  ;;  %s1597_s22 = smov [#allocation7]  }
  0x11   : > { %s125_s23 = sshll.u32 %s1597_s22, 4  ;;  %s28_s25 = sadd.s32 1, %s1591_s13  ;;  %s126_s23 = int_to_ptr.vmem [resolvable:$true] %s125_s23 }
  0x12   : > { %s2033_s21 = scalar_select %p1678_p8, 1, 0 }
  0x13   : > { %p1326_p9 = pneg %p1678_p8  ;;  %s1451_s28 = scalar_lea.hbm %s2023_s1, 8192 }
  0x14   : > { %p1452_p11 = scmp.ne.s32.totalorder %s2023_s1, %s1451_s28  ;;  %p1458_p3 = scmp.lt.u32.totalorder %s1451_s28, %s2023_s1 }
  0x15   : > { %p1686_p10 = pnand %p1326_p9, %p1658_p1 }
  0x17   : > { %p1453_p12 = pneg %p1686_p10 }
  0x19   : > { %p1454_p13 = pnand %p1453_p12, %p1452_p11 }
  0x1b   : > { %p1455_p0 = pneg %p1454_p13 }
  0x1d   : > { %p1460_p5 = pnand %p1458_p3, %p1455_p0 }
  0x1f   : > { %1463 = shalt.err (!%p1460_p5)
}
  0x20   : > { %s1464_s5 = scalar_lea.vmem %s126_s23, 8192  ;;  %p1472_p1 = scmp.lt.s32.totalorder %s126_s23, %s126_s23 }
  0x21   : > { %p1465_p7 = scmp.ne.s32.totalorder %s126_s23, %s1464_s5  ;;  %p1473_p4 = scmp.lt.s32.totalorder %s1464_s5, %s1464_s5 }
  0x23   : > { %p1467_p9 = pnand %p1465_p7, %p1453_p12  ;;  %p1474_p8 = por %p1473_p4, %p1472_p1 }
  0x25   : > { %p1468_p6 = pneg %p1467_p9 }
  0x27   : > { %p1475_p2 = pnand %p1474_p8, %p1468_p6 }
  0x29   : > { %1478 = shalt.err (!%p1475_p2)
}
  0x2a   : > { %s1598_s6 = smov 512   ;;  %s1599_s7 = smov 32  }
  0x2b   : > { %1329 = dma.hbm_to_vmem [thread:$0]  (!%p1686_p10), %s2023_s1, 8192, %s126_s23, [#allocation8], %s1598_s6, %s1598_s6, %s1599_s7  }
  0x2c   : > { %p29_p1 = scmp.ge.s32.totalorder %s28_s25, 3  ;;  %s40_s16 = sadd.s32 1, %s1583_s11 }
  0x2d   : > { %p47_p2 = scmp.ne.s32.totalorder %s1583_s11, %s1579_s10  ;;  %p48_p4 = scmp.eq.s32.totalorder %s1595_s14, 0 }
  0x2e   : > { %s2048_s25 = smov (%p29_p1, %s28_s25), 0  ;;  %p2035_p8 = scmp.ne.s32.totalorder %s2030_s18, 0 }
  0x2f   : > { %p49_p6 = por %p48_p4, %p47_p2  ;;  %s35_s26 = ssub.s32 %s1591_s13, %s2048_s25 }
  0x30   : > { %p1715_p11 = por %p2035_p8, %p47_p2  ;;  %p1339_p12 = scmp.lt.s32.totalorder %s1595_s14, 3 }
  0x31   : > { %p38_p13 = scmp.eq.s32.totalorder %s35_s26, 0  ;;  %s139_s24 = sand.u32 1, %s1583_s11  }
  0x32   : > { %s1315_s27 = smul.u32 24, %s139_s24  ;;  %p1727_p10 = pnand %p1339_p12, %p49_p6 }
  0x33   : > { %s1724_s28 = scalar_select %p38_p13, %s1583_s11, %s40_s16  }
  0x34   : > { %s1122_s23 = smul.u32 384, %s1591_s13  ;;  %s143_s29 = scalar_lea.vmem [#allocation4], %s1315_s27 }
  0x35   : > { %s153_s30 = sshll.u32 %s143_s29, 4  ;;  %s1738_s6 = scalar_lea.sflag [#allocation5], %s139_s24  ;;  %s1736_s30 = int_to_ptr.vmem [resolvable:$true] %s153_s30 }
  0x36   : > { %s1734_s5 = scalar_lea.hbm %s2022_s0, %s1122_s23  ;;  %p1481_p3 = pneg %p1727_p10 }
  0x37   : > { %s1479_s7 = scalar_lea.hbm %s1734_s5, 384  ;;  %s1484_s16 = scalar_lea.hbm %s2022_s0, 1152 }
  0x38   : > { %p1480_p0 = scmp.ne.s32.totalorder %s1734_s5, %s1479_s7  ;;  %p1485_p9 = scmp.lt.u32.totalorder %s1734_s5, %s2022_s0 }
  0x39   : > { %p1486_p1 = scmp.lt.u32.totalorder %s1484_s16, %s1479_s7  ;;  %p1488_p4 = scmp.lt.u32.totalorder %s1479_s7, %s1734_s5 }
  0x3a   : > { %p1482_p5 = pnand %p1481_p3, %p1480_p0 }
  0x3b   : > { %p1487_p2 = por %p1486_p1, %p1485_p9 }
  0x3c   : > { %p1483_p7 = pneg %p1482_p5 }
  0x3d   : > { %p1489_p6 = por %p1488_p4, %p1487_p2 }
  0x3f   : > { %p1490_p8 = pnand %p1489_p6, %p1483_p7 }
  0x41   : > { %1493 = shalt.err (!%p1490_p8)
}
  0x42   : > { %s1494_s24 = scalar_lea.vmem %s1736_s30, 384  ;;  %s1600_s23 = smov [#allocation4]  }
  0x43   : > { %p1495_p12 = scmp.ne.s32.totalorder %s1736_s30, %s1494_s24  ;;  %s1499_s29 = sshll.u32 %s1600_s23, 4  ;;  %s1500_s29 = int_to_ptr.vmem [resolvable:$false] %s1499_s29 }
  0x44   : > { %s1501_s4 = scalar_lea.vmem %s1500_s29, 768  ;;  %p1502_p5 = scmp.lt.s32.totalorder %s1736_s30, %s1500_s29 }
  0x45   : > { %p1497_p13 = pnand %p1495_p12, %p1481_p3  ;;  %p1503_p9 = scmp.lt.s32.totalorder %s1501_s4, %s1494_s24 }
  0x47   : > { %p1498_p0 = pneg %p1497_p13  ;;  %p1504_p1 = por %p1503_p9, %p1502_p5 }
  0x49   : > { %p1505_p2 = pnand %p1504_p1, %p1498_p0 }
  0x4b   : > { %1508 = shalt.err (!%p1505_p2)
}
  0x4c   : > { %s1601_s18 = smov 128   ;;  %s1602_s7 = smov 8  }
  0x4d   : > { %1333 = dma.hbm_to_vmem [thread:$0]  (!%p1727_p10), %s1734_s5, 384, %s1736_s30, %s1738_s6, %s1601_s18, %s1601_s18, %s1602_s7  }
  0x4e   : > { %p2038_p3 = scmp.ne.s32.totalorder %s2033_s21, 0 }
  0x4f   : > { %s1769_s8 = sand.u32 (!%p2038_p3), 1, %s1579_s10   ;;  %p2039_p7 = scmp.ne.s32.totalorder (!%p2038_p3), %s2031_s19, 0 }
  0x50   : > { %165 = sbr.rel (%p2038_p3) target bundleno = 941 (0x3ad), region = 28  ;;  %s168_s16 = scalar_lea.sflag (!%p2038_p3), [#allocation5], %s1769_s8 }
  0x51   : > { %s1316_s15 = smul.u32 (!%p2038_p3), 24, %s1769_s8 }
  0x53   : > { %s1773_s26 = scalar_lea.vmem (!%p2038_p3), [#allocation4], %s1316_s15 }
  0x57   : > { %1562 = dma.done.wait (%p2039_p7), %s168_s16, 384  }
  0x58   : > { %1564 = vsyncadd (%p2039_p7), %s168_s16, 4294966912  ;;  %p2040_p10 = scmp.ne.s32.totalorder %s2029_s17, 0 }
  0x5a   : > { %1566 = dma.done.wait (%p2040_p10), [#allocation8], 8192  }
  0x5b   : > { %1568 = vsyncadd (%p2040_p10), [#allocation8], 4294959104  ;;  %s1317_s21 = smul.u32 6, %s1769_s8  ;;  %p1102_p4 = scmp.ne.s32.totalorder %s1587_s12, 0 }
  0x5c   : > { %v1603_v0 = vmov (!%p1102_p4), 0.0  }
  0x5d   : > { %s1784_s30 = scalar_lea.vmem [#allocation9], %s1317_s21  ;;  %201 = sbr.rel (%p1102_p4) target bundleno = 100 (0x64), region = 40  ;;  %202 = vst [vmem:[#allocation2] sm:$0x3] (!%p1102_p4), %v1603_v0  ;;  %203 = vst [vmem:[#allocation3] sm:$0x3] (!%p1102_p4), %v1603_v0 }
  0x64 PF: > { %v207_v1 = vld [vmem:[#allocation7 + $0x8] sm:$0xff]  ;;  %v206_v3 = vld [vmem:[#allocation7] sm:$0xff]  ;;  %v1604_v8 = vmov 0.0   ;;  %v209_v20 = vld [vmem:[#allocation7 + $0x18] sm:$0xff]  ;;  %s1121_s17 = smul.u32 96, %s1587_s12  ;;  %s997_s19 = sshll.u32 %s1784_s30, 4  ;;  %s1973_s19 = int_to_ptr.vmem [resolvable:$true] %s997_s19 }
  0x65   : > { %v211_v2 = vld [vmem:[#allocation7 + $0x28] sm:$0xff]  ;;  %v210_v5 = vld [vmem:[#allocation7 + $0x20] sm:$0xff]  ;;  %357 = vmatprep.mubr.f32.mxu0 %v1604_v8  ;;  %428 = vmatprep.mubr.f32.mxu1 %v1604_v8  ;;  %v213_v21 = vld [vmem:[#allocation7 + $0x38] sm:$0xff]  ;;  %s983_s27 = scalar_lea.sflag [#allocation6], %s1769_s8  ;;  %s1509_s24 = scalar_lea.vmem %s1973_s19, 96 }
  0x66   : > { %v1787_v4 = vpack.c.bf16 %v211_v2, %v207_v1  ;;  %v215_v6 = vld [vmem:[#allocation7 + $0x48] sm:$0xff]  ;;  %v1791_v9 = vpack.c.bf16 %v210_v5, %v206_v3  ;;  %v214_v11 = vld [vmem:[#allocation7 + $0x40] sm:$0xff]  ;;  %v1802_v23 = vpack.c.bf16 %v213_v21, %v209_v20  ;;  %v208_v24 = vld [vmem:[#allocation7 + $0x10] sm:$0xff]  ;;  %s1971_s6 = scalar_lea.hbm %s2024_s2, %s1121_s17  ;;  %p1510_p6 = scmp.ne.s32.totalorder %s1973_s19, %s1509_s24 }
  0x67   : > { %v219_v7 = vld [vmem:[#allocation7 + $0x68] sm:$0xff]  ;;  %v218_v12 = vld [vmem:[#allocation7 + $0x60] sm:$0xff]  ;;  %v212_v25 = vld [vmem:[#allocation7 + $0x30] sm:$0xff]  ;;  %s1606_s12 = smov [#allocation9]  }
  0x68   : > { %v1793_v10 = vpack.c.bf16 %v219_v7, %v215_v6  ;;  %v223_v13 = vld [vmem:[#allocation7 + $0x88] sm:$0xff]  ;;  %1124 = vmatprep.subr.bf16.mxu0 %v1787_v4  ;;  %v1797_v15 = vpack.c.bf16 %v218_v12, %v214_v11  ;;  %v222_v16 = vld [vmem:[#allocation7 + $0x80] sm:$0xff]  ;;  %v1804_v26 = vpack.c.bf16 %v212_v25, %v208_v24  ;;  %1156 = vmatprep.subr.bf16.mxu1 %v1802_v23  ;;  %v217_v28 = vld [vmem:[#allocation7 + $0x58] sm:$0xff]  ;;  %p1511_p8 = pnand %p1510_p6, %p1715_p11  ;;  %s1513_s23 = sshll.u32 %s1606_s12, 4  ;;  %s1514_s23 = int_to_ptr.vmem [resolvable:$false] %s1513_s23 }
  0x69   : > { %v227_v14 = vld [vmem:[#allocation7 + $0xa8] sm:$0xff]  ;;  %1126 = vmatpush1.bf16.msra.mxu0 %v1791_v9  ;;  %v226_v17 = vld [vmem:[#allocation7 + $0xa0] sm:$0xff]  ;;  %v221_v29 = vld [vmem:[#allocation7 + $0x78] sm:$0xff]  ;;  %s1515_s29 = scalar_lea.vmem %s1514_s23, 192  ;;  %p1516_p13 = scmp.lt.s32.totalorder %s1973_s19, %s1514_s23 }
  0x6a   : > { %1128 = vmatprep.subr.bf16.mxu0 %v1793_v10  ;;  %v1800_v18 = vpack.c.bf16 %v227_v14, %v223_v13  ;;  %v231_v19 = vld [vmem:[#allocation7 + $0xc8] sm:$0xff]  ;;  %v1807_v27 = vpack.c.bf16 %v226_v17, %v222_v16  ;;  %v216_v30 = vld [vmem:[#allocation7 + $0x50] sm:$0xff]  ;;  %v230_v32 = vld [vmem:[#allocation7 + $0xc0] sm:$0xff]  ;;  %1158 = vmatpush1.bf16.msra.mxu1 %v1804_v26  ;;  %v1814_v34 = vpack.c.bf16 %v221_v29, %v217_v28  ;;  %p1512_p12 = pneg %p1511_p8  ;;  %p1517_p0 = scmp.lt.s32.totalorder %s1515_s29, %s1509_s24 }
  0x6b   : > { %v235_v22 = vld [vmem:[#allocation7 + $0xe8] sm:$0xff]  ;;  %v234_v33 = vld [vmem:[#allocation7 + $0xe0] sm:$0xff]  ;;  %v220_v35 = vld [vmem:[#allocation7 + $0x70] sm:$0xff] }
  0x6c   : > { %v1811_v31 = vpack.c.bf16 %v235_v22, %v231_v19  ;;  %v239_v36 = vld [vmem:[#allocation7 + $0x108] sm:$0xff]  ;;  %v1816_v38 = vpack.c.bf16 %v220_v35, %v216_v30  ;;  %v225_v39 = vld [vmem:[#allocation7 + $0x98] sm:$0xff]  ;;  %1160 = vmatprep.subr.bf16.mxu1 %v1814_v34  ;;  %v224_v41 = vld [vmem:[#allocation7 + $0x90] sm:$0xff]  ;;  %v1820_v43 = vpack.c.bf16 %v234_v33, %v230_v32  ;;  %p1518_p5 = por %p1517_p0, %p1516_p13 }
  0x6d   : > { %1130 = vmatpush1.bf16.msra.mxu0 %v1797_v15  ;;  %v243_v37 = vld [vmem:[#allocation7 + $0x128] sm:$0xff]  ;;  %v229_v40 = vld [vmem:[#allocation7 + $0xb8] sm:$0xff]  ;;  %v228_v42 = vld [vmem:[#allocation7 + $0xb0] sm:$0xff] }
  0x6e   : > { %1132 = vmatprep.subr.bf16.mxu0 %v1800_v18  ;;  %v238_v44 = vld [vmem:[#allocation7 + $0x100] sm:$0xff]  ;;  %v1822_v46 = vpack.c.bf16 %v229_v40, %v225_v39  ;;  %v1825_v47 = vpack.c.bf16 %v243_v37, %v239_v36  ;;  %1162 = vmatpush1.bf16.msra.mxu1 %v1816_v38  ;;  %v247_v48 = vld [vmem:[#allocation7 + $0x148] sm:$0xff]  ;;  %v1828_v49 = vpack.c.bf16 %v228_v42, %v224_v41  ;;  %v233_v50 = vld [vmem:[#allocation7 + $0xd8] sm:$0xff]  ;;  %p1519_p9 = pnand %p1518_p5, %p1512_p12 }
  0x6f   : > { %v242_v45 = vld [vmem:[#allocation7 + $0x120] sm:$0xff]  ;;  %v237_v51 = vld [vmem:[#allocation7 + $0xf8] sm:$0xff]  ;;  %v251_v52 = vld [vmem:[#allocation7 + $0x168] sm:$0xff] }
  0x70   : > { %1164 = vmatprep.subr.bf16.mxu1 %v1822_v46  ;;  %v1831_v53 = vpack.c.bf16 %v237_v51, %v233_v50  ;;  %v232_v54 = vld [vmem:[#allocation7 + $0xd0] sm:$0xff]  ;;  %v1834_v56 = vpack.c.bf16 %v242_v45, %v238_v44  ;;  %v241_v57 = vld [vmem:[#allocation7 + $0x118] sm:$0xff]  ;;  %v1837_v59 = vpack.c.bf16 %v251_v52, %v247_v48  ;;  %v246_v60 = vld [vmem:[#allocation7 + $0x140] sm:$0xff]  ;;  %v1605_v51 = vmov 1983009808  }
  0x71   : > { %1134 = vmatpush1.bf16.msra.mxu0 %v1807_v27  ;;  %v236_v55 = vld [vmem:[#allocation7 + $0xf0] sm:$0xff]  ;;  %v245_v58 = vld [vmem:[#allocation7 + $0x138] sm:$0xff]  ;;  %v250_v61 = vld [vmem:[#allocation7 + $0x160] sm:$0xff]  ;;  %v274_v52 = vunpack.c.l.s4 %v1605_v51 }
  0x72   : > { %1136 = vmatprep.subr.bf16.mxu0 %v1811_v31  ;;  %1166 = vmatpush1.bf16.msra.mxu1 %v1828_v49  ;;  %v255_v62 = vld [vmem:[#allocation7 + $0x188] sm:$0xff]  ;;  %v1840_v63 = vpack.c.bf16 %v236_v55, %v232_v54  ;;  %v1843_v1 = vpack.c.bf16 %v245_v58, %v241_v57  ;;  %v240_v2 = vld [vmem:[#allocation7 + $0x110] sm:$0xff]  ;;  %v249_v5 = vld [vmem:[#allocation7 + $0x158] sm:$0xff]  ;;  %v1846_v7 = vpack.c.bf16 %v250_v61, %v246_v60  ;;  %v276_v54 = vlaneseq }
  0x73   : > { %v259_v0 = vld [vmem:[#allocation7 + $0x1a8] sm:$0xff]  ;;  %1168 = vmatprep.subr.bf16.mxu1 %v1831_v53  ;;  %v244_v3 = vld [vmem:[#allocation7 + $0x130] sm:$0xff]  ;;  %v253_v6 = vld [vmem:[#allocation7 + $0x178] sm:$0xff]  ;;  %v275_v55 = vunpack.c.0.s8 %v274_v52 }
  0x74   : > { %v1849_v11 = vpack.c.bf16 %v259_v0, %v255_v62  ;;  %v254_v12 = vld [vmem:[#allocation7 + $0x180] sm:$0xff]  ;;  %v263_v14 = vld [vmem:[#allocation7 + $0x1c8] sm:$0xff]  ;;  %v1852_v16 = vpack.c.bf16 %v244_v3, %v240_v2  ;;  %v1855_v19 = vpack.c.bf16 %v253_v6, %v249_v5  ;;  %v248_v20 = vld [vmem:[#allocation7 + $0x150] sm:$0xff]  ;;  %v277_v57 = vshrl.u32 %v276_v54, 7 }
  0x75   : > { %1138 = vmatpush1.bf16.msra.mxu0 %v1820_v43  ;;  %v258_v13 = vld [vmem:[#allocation7 + $0x1a0] sm:$0xff]  ;;  %v267_v17 = vld [vmem:[#allocation7 + $0x1e8] sm:$0xff]  ;;  %v252_v21 = vld [vmem:[#allocation7 + $0x170] sm:$0xff] }
  0x76   : > { %1140 = vmatprep.subr.bf16.mxu0 %v1825_v47  ;;  %1170 = vmatpush1.bf16.msra.mxu1 %v1840_v63  ;;  %v257_v22 = vld [vmem:[#allocation7 + $0x198] sm:$0xff]  ;;  %v1858_v25 = vpack.c.bf16 %v258_v13, %v254_v12  ;;  %v1861_v28 = vpack.c.bf16 %v267_v17, %v263_v14  ;;  %v262_v29 = vld [vmem:[#allocation7 + $0x1c0] sm:$0xff]  ;;  %v1864_v32 = vpack.c.bf16 %v252_v21, %v248_v20  ;;  %v256_v35 = vld [vmem:[#allocation7 + $0x190] sm:$0xff] }
  0x77   : > { %1172 = vmatprep.subr.bf16.mxu1 %v1843_v1  ;;  %v261_v24 = vld [vmem:[#allocation7 + $0x1b8] sm:$0xff]  ;;  %v266_v30 = vld [vmem:[#allocation7 + $0x1e0] sm:$0xff]  ;;  %v260_v36 = vld [vmem:[#allocation7 + $0x1b0] sm:$0xff]  ;;  %v1921_v58 = vsub.s32 %v275_v55, %v277_v57 }
  0x78   : > { %v1867_v33 = vpack.c.bf16 %v261_v24, %v257_v22  ;;  %v265_v37 = vld [vmem:[#allocation7 + $0x1d8] sm:$0xff]  ;;  %v1870_v40 = vpack.c.bf16 %v266_v30, %v262_v29  ;;  %v1874_v41 = vpack.c.bf16 %v260_v36, %v256_v35  ;;  %v264_v44 = vld [vmem:[#allocation7 + $0x1d0] sm:$0xff]  ;;  %v204_v48 = vld [vmem:[#allocation2] sm:$0x3] }
  0x79   : > { %1142 = vmatpush1.bf16.msra.mxu0 %v1834_v56  ;;  %v269_v39 = vld [vmem:[#allocation7 + $0x1f8] sm:$0xff]  ;;  %v268_v45 = vld [vmem:[#allocation7 + $0x1f0] sm:$0xff] }
  0x7a   : > { %1144 = vmatprep.subr.bf16.mxu0 %v1837_v59  ;;  %1174 = vmatpush1.bf16.msra.mxu1 %v1852_v16  ;;  %v1877_v42 = vpack.c.bf16 %v269_v39, %v265_v37  ;;  %v1881_v50 = vpack.c.bf16 %v268_v45, %v264_v44  ;;  %v270_v60 = vld [vmem:[%s1773_s26] sm:$0xff] }
  0x7b   : > { %1176 = vmatprep.subr.bf16.mxu1 %v1855_v19  ;;  %v279_v61 = vrot.slane %v270_v60, %v1921_v58  ;;  %v272_v62 = vcombine.high %v270_v60, %v270_v60  ;;  %v205_v39 = vld [vmem:[#allocation3] sm:$0x3] }
  0x7d   : > { %1146 = vmatpush1.bf16.msra.mxu0 %v1846_v7  ;;  %v287_v0 = vcombine.high %v279_v61, %v279_v61 }
  0x7e   : > { %1148 = vmatprep.subr.bf16.mxu0 %v1849_v11  ;;  %1178 = vmatpush1.bf16.msra.mxu1 %v1864_v32 }
  0x7f   : > { %1180 = vmatprep.subr.bf16.mxu1 %v1867_v33 }
  0x81   : > { %1150 = vmatpush1.bf16.msra.mxu0 %v1858_v25 }
  0x82   : > { %1152 = vmatprep.subr.bf16.mxu0 %v1861_v28  ;;  %1182 = vmatpush1.bf16.msra.mxu1 %v1874_v41 }
  0x83   : > { %1184 = vmatprep.subr.bf16.mxu1 %v1877_v42 }
  0x85   : > { %1154 = vmatpush1.bf16.msra.mxu0 %v1870_v40 }
  0x86   : > { %1188 = vmatprep.subr.bf16.mxu0 %v1787_v4  ;;  %1186 = vmatpush1.bf16.msra.mxu1 %v1881_v50 }
  0x87   : > { %1220 = vmatprep.subr.bf16.mxu1 %v1802_v23 }
  0x88   : > { %358 = vmatmul.mubr.f32.vlgmr.msra.gmra.mrb[0].mxu0 %v204_v48 }
  0x89   : > { %1190 = vmatpush1.bf16.msra.mxu0 %v1791_v9  ;;  %616 = vmatprep.mubr.f32.mxu0 %v1604_v8 }
  0x8a   : > { %1192 = vmatprep.subr.bf16.mxu0 %v1793_v10  ;;  %429 = vmatmul.mubr.f32.vlgmr.msra.gmra.mrb[0].mxu1 %v204_v48 }
  0x8b   : > { %1222 = vmatpush1.bf16.msra.mxu1 %v1804_v26  ;;  %687 = vmatprep.mubr.f32.mxu1 %v1604_v8 }
  0x8c   : > { %1224 = vmatprep.subr.bf16.mxu1 %v1814_v34 }
  0x8d   : > { %1194 = vmatpush1.bf16.msra.mxu0 %v1797_v15 }
  0x8e   : > { %1196 = vmatprep.subr.bf16.mxu0 %v1800_v18 }
  0x8f   : > { %1226 = vmatpush1.bf16.msra.mxu1 %v1816_v38 }
  0x90   : > { %1228 = vmatprep.subr.bf16.mxu1 %v1822_v46 }
  0x91   : > { %1198 = vmatpush1.bf16.msra.mxu0 %v1807_v27 }
  0x92   : > { %1200 = vmatprep.subr.bf16.mxu0 %v1811_v31 }
  0x93   : > { %1230 = vmatpush1.bf16.msra.mxu1 %v1828_v49 }
  0x94   : > { %1232 = vmatprep.subr.bf16.mxu1 %v1831_v53 }
  0x95   : > { %1202 = vmatpush1.bf16.msra.mxu0 %v1820_v43 }
  0x96   : > { %1204 = vmatprep.subr.bf16.mxu0 %v1825_v47 }
  0x97   : > { %1234 = vmatpush1.bf16.msra.mxu1 %v1840_v63 }
  0x98   : > { %1236 = vmatprep.subr.bf16.mxu1 %v1843_v1 }
  0x99   : > { %1206 = vmatpush1.bf16.msra.mxu0 %v1834_v56 }
  0x9a   : > { %1208 = vmatprep.subr.bf16.mxu0 %v1837_v59 }
  0x9b   : > { %1238 = vmatpush1.bf16.msra.mxu1 %v1852_v16 }
  0x9c   : > { %1240 = vmatprep.subr.bf16.mxu1 %v1855_v19 }
  0x9d   : > { %1210 = vmatpush1.bf16.msra.mxu0 %v1846_v7 }
  0x9e   : > { %1212 = vmatprep.subr.bf16.mxu0 %v1849_v11 }
  0x9f   : > { %1242 = vmatpush1.bf16.msra.mxu1 %v1864_v32 }
  0xa0   : > { %1244 = vmatprep.subr.bf16.mxu1 %v1867_v33 }
  0xa1   : > { %1214 = vmatpush1.bf16.msra.mxu0 %v1858_v25 }
  0xa2   : > { %1216 = vmatprep.subr.bf16.mxu0 %v1861_v28 }
  0xa3   : > { %1246 = vmatpush1.bf16.msra.mxu1 %v1874_v41 }
  0xa4   : > { %1248 = vmatprep.subr.bf16.mxu1 %v1877_v42 }
  0xa5   : > { %1218 = vmatpush1.bf16.msra.mxu0 %v1870_v40 }
  0xa6   : > { %1252 = vmatprep.subr.bf16.mxu0 %v1787_v4  ;;  %v286_v4 = vrot.slane %v272_v62, %v1921_v58 }
  0xa7   : > { %1250 = vmatpush1.bf16.msra.mxu1 %v1881_v50 }
  0xa8   : > { %1284 = vmatprep.subr.bf16.mxu1 %v1802_v23  ;;  %v288_v23 = vcombine.high %v286_v4, %v286_v4 }
 0x15b   : > { %v359_v2 = vpop.f32.mrb[0].mxu0 }
 0x15c   : > { %v360_v3 = vadd.f32 %v359_v2, %v279_v61  ;;  %v361_v5 = vpop.f32.mrb[1].mxu0  ;;  %v1111_v2 = vld [vmem:[%s1773_s26 + $0x10] sm:$0xff] }
 0x15d   : > { %v362_v6 = vadd.f32 %v361_v5, %v287_v0  ;;  %v430_v14 = vpop.f32.mrb[0].mxu1  ;;  %v791_v5 = vcombine.high %v1111_v2, %v1111_v2 }
 0x15e   : > { %v1103_v12 = vmul.f32 -1.442695, %v360_v3  ;;  %v432_v17 = vpop.f32.mrb[1].mxu1  ;;  %v431_v22 = vadd.f32 %v430_v14, %v286_v4  ;;  %v798_v3 = vrot.slane %v1111_v2, %v1921_v58 }
 0x15f   : > { %v1104_v13 = vmul.f32 -1.442695, %v362_v6  ;;  %v433_v20 = vadd.f32 %v432_v17, %v288_v23  ;;  %v805_v23 = vrot.slane %v791_v5, %v1921_v58 }
 0x160   : > { %1403 = vpow2.f32 %v1103_v12  ;;  %v806_v6 = vcombine.high %v798_v3, %v798_v3 }
 0x161   : > { %1405 = vpow2.f32 %v1104_v13  ;;  %v1105_v21 = vmul.f32 -1.442695, %v433_v20 }
 0x163   : > { %1407 = vpow2.f32 %v1105_v21 }
 0x164   : > { %1409 = vtanh.f32 %v431_v22 }
 0x16a   : > { %v1404_v24 = vpop.eup %1403 }
 0x16b   : > { %v1406_v29 = vpop.eup %1405  ;;  %v438_v30 = vadd.f32 1.0, %v1404_v24 }
 0x16c   : > { %v444_v35 = vadd.f32 1.0, %v1406_v29  ;;  %v807_v29 = vcombine.high %v805_v23, %v805_v23 }
 0x16d   : > { %1411 = vrcp.f32 %v438_v30  ;;  %v1408_v36 = vpop.eup %1407 }
 0x16e   : > { %1413 = vrcp.f32 %v444_v35  ;;  %v1410_v37 = vpop.eup %1409  ;;  %v451_v45 = vadd.f32 1.0, %v1408_v36 }
 0x170   : > { %1415 = vrcp.f32 %v451_v45 }
 0x177   : > { %v1412_v44 = vpop.eup %1411 }
 0x178   : > { %v1414_v48 = vpop.eup %1413  ;;  %v455_v51 = vmul.f32 %v1412_v44, %v1410_v37 }
 0x179   : > { %v454_v52 = vmul.f32 %v1414_v48, %v205_v39 }
 0x17a   : > { %v1416_v55 = vpop.eup %1415 }
 0x17b   : > { %v456_v54 = vadd.f32 %v455_v51, %v454_v52 }
 0x17d   : > { %1417 = vtanh.f32 %v456_v54  ;;  %459 = vst [vmem:[#allocation3] sm:$0x3] %v456_v54 }
 0x187   : > { %v1418_v57 = vpop.eup %1417 }
 0x188   : > { %v458_v60 = vmul.f32 %v1418_v57, %v1416_v55 }
 0x18a   : > { %460 = vst [vmem:[#allocation2] sm:$0x3] %v458_v60  ;;  %461 = vst [vmem:[%s1784_s30] sm:$0x3] %v458_v60 }
 0x191   : > { %v462_v61 = vld [vmem:[#allocation2] sm:$0x3] }
 0x192   : > { %617 = vmatmul.mubr.f32.vlgmr.msra.gmra.mrb[2].mxu0 %v462_v61  ;;  %688 = vmatmul.mubr.f32.vlgmr.msra.gmra.mrb[2].mxu1 %v462_v61 }
 0x193   : > { %1254 = vmatpush1.bf16.msra.mxu0 %v1791_v9  ;;  %1286 = vmatpush1.bf16.msra.mxu1 %v1804_v26 }
 0x194   : > { %1256 = vmatprep.subr.bf16.mxu0 %v1793_v10  ;;  %1288 = vmatprep.subr.bf16.mxu1 %v1814_v34 }
 0x195   : > { %876 = vmatprep.mubr.f32.mxu0 %v1604_v8  ;;  %947 = vmatprep.mubr.f32.mxu1 %v1604_v8  ;;  %v1106_v8 = vld [vmem:[%s1773_s26 + $0x8] sm:$0xff] }
 0x196   : > { %v538_v9 = vrot.slane %v1106_v8, %v1921_v58  ;;  %v531_v10 = vcombine.high %v1106_v8, %v1106_v8 }
 0x197   : > { %1258 = vmatpush1.bf16.msra.mxu0 %v1797_v15  ;;  %1290 = vmatpush1.bf16.msra.mxu1 %v1816_v38 }
 0x198   : > { %1260 = vmatprep.subr.bf16.mxu0 %v1800_v18  ;;  %1292 = vmatprep.subr.bf16.mxu1 %v1822_v46  ;;  %v546_v15 = vcombine.high %v538_v9, %v538_v9  ;;  %v545_v26 = vrot.slane %v531_v10, %v1921_v58 }
 0x19b   : > { %1262 = vmatpush1.bf16.msra.mxu0 %v1807_v27  ;;  %1294 = vmatpush1.bf16.msra.mxu1 %v1828_v49  ;;  %v547_v49 = vcombine.high %v545_v26, %v545_v26 }
 0x19c   : > { %1264 = vmatprep.subr.bf16.mxu0 %v1811_v31  ;;  %1296 = vmatprep.subr.bf16.mxu1 %v1831_v53 }
 0x19f   : > { %1266 = vmatpush1.bf16.msra.mxu0 %v1820_v43  ;;  %1298 = vmatpush1.bf16.msra.mxu1 %v1840_v63 }
 0x1a0   : > { %1268 = vmatprep.subr.bf16.mxu0 %v1825_v47  ;;  %1300 = vmatprep.subr.bf16.mxu1 %v1843_v1 }
 0x1a3   : > { %1270 = vmatpush1.bf16.msra.mxu0 %v1834_v56  ;;  %1302 = vmatpush1.bf16.msra.mxu1 %v1852_v16 }
 0x1a4   : > { %1272 = vmatprep.subr.bf16.mxu0 %v1837_v59  ;;  %1304 = vmatprep.subr.bf16.mxu1 %v1855_v19 }
 0x1a7   : > { %1274 = vmatpush1.bf16.msra.mxu0 %v1846_v7  ;;  %1306 = vmatpush1.bf16.msra.mxu1 %v1864_v32 }
 0x1a8   : > { %1276 = vmatprep.subr.bf16.mxu0 %v1849_v11  ;;  %1308 = vmatprep.subr.bf16.mxu1 %v1867_v33  ;;  %v463_v33 = vld [vmem:[#allocation3] sm:$0x3] }
 0x1ab   : > { %1278 = vmatpush1.bf16.msra.mxu0 %v1858_v25  ;;  %1310 = vmatpush1.bf16.msra.mxu1 %v1874_v41 }
 0x1ac   : > { %1280 = vmatprep.subr.bf16.mxu0 %v1861_v28  ;;  %1312 = vmatprep.subr.bf16.mxu1 %v1877_v42 }
 0x1af   : > { %1282 = vmatpush1.bf16.msra.mxu0 %v1870_v40  ;;  %1314 = vmatpush1.bf16.msra.mxu1 %v1881_v50 }
 0x265   : > { %v618_v18 = vpop.f32.mrb[2].mxu0  ;;  %v689_v27 = vpop.f32.mrb[2].mxu1 }
 0x266   : > { %v619_v31 = vadd.f32 %v618_v18, %v538_v9  ;;  %v620_v34 = vpop.f32.mrb[3].mxu0  ;;  %v691_v38 = vpop.f32.mrb[3].mxu1  ;;  %v690_v59 = vadd.f32 %v689_v27, %v545_v26 }
 0x267   : > { %v621_v43 = vadd.f32 %v620_v34, %v546_v15  ;;  %v692_v53 = vadd.f32 %v691_v38, %v547_v49 }
 0x268   : > { %v1107_v46 = vmul.f32 -1.442695, %v619_v31 }
 0x269   : > { %v1108_v47 = vmul.f32 -1.442695, %v621_v43  ;;  %v1109_v56 = vmul.f32 -1.442695, %v692_v53 }
 0x26a   : > { %1419 = vpow2.f32 %v1107_v46 }
 0x26b   : > { %1421 = vpow2.f32 %v1108_v47 }
 0x26c   : > { %1423 = vpow2.f32 %v1109_v56 }
 0x26d   : > { %1425 = vtanh.f32 %v690_v59 }
 0x274   : > { %v1420_v63 = vpop.eup %1419 }
 0x275   : > { %v1422_v1 = vpop.eup %1421  ;;  %v697_v7 = vadd.f32 1.0, %v1420_v63 }
 0x276   : > { %v703_v11 = vadd.f32 1.0, %v1422_v1  ;;  %v1424_v16 = vpop.eup %1423 }
 0x277   : > { %1427 = vrcp.f32 %v697_v7  ;;  %v1426_v19 = vpop.eup %1425  ;;  %v710_v40 = vadd.f32 1.0, %v1424_v16 }
 0x278   : > { %1429 = vrcp.f32 %v703_v11 }
 0x279   : > { %1431 = vrcp.f32 %v710_v40 }
 0x281   : > { %v1428_v25 = vpop.eup %1427 }
 0x282   : > { %v1430_v28 = vpop.eup %1429  ;;  %v714_v32 = vmul.f32 %v1428_v25, %v1426_v19 }
 0x283   : > { %v713_v41 = vmul.f32 %v1430_v28, %v463_v33  ;;  %v1432_v50 = vpop.eup %1431 }
 0x285   : > { %v715_v42 = vadd.f32 %v714_v32, %v713_v41 }
 0x287   : > { %1433 = vtanh.f32 %v715_v42  ;;  %718 = vst [vmem:[#allocation3] sm:$0x3] %v715_v42 }
 0x28e   : > { %v723_v55 = vld [vmem:[#allocation3] sm:$0x3] }
 0x291   : > { %v1434_v62 = vpop.eup %1433 }
 0x292   : > { %v717_v0 = vmul.f32 %v1434_v62, %v1432_v50 }
 0x294   : > { %719 = vst [vmem:[#allocation2] sm:$0x3] %v717_v0  ;;  %1110 = vst [vmem:[%s1784_s30 + $0x2] sm:$0x3] %v717_v0 }
 0x29b   : > { %v722_v4 = vld [vmem:[#allocation2] sm:$0x3] }
 0x29c   : > { %877 = vmatmul.mubr.f32.vlgmr.msra.gmra.mrb[4].mxu0 %v722_v4  ;;  %948 = vmatmul.mubr.f32.vlgmr.msra.gmra.mrb[4].mxu1 %v722_v4 }
 0x36f   : > { %v878_v12 = vpop.f32.mrb[4].mxu0  ;;  %v949_v13 = vpop.f32.mrb[4].mxu1 }
 0x370   : > { %v879_v14 = vadd.f32 %v878_v12, %v798_v3  ;;  %v880_v17 = vpop.f32.mrb[5].mxu0  ;;  %v951_v20 = vpop.f32.mrb[5].mxu1  ;;  %v950_v36 = vadd.f32 %v949_v13, %v805_v23 }
 0x371   : > { %v881_v21 = vadd.f32 %v880_v17, %v806_v6  ;;  %v952_v30 = vadd.f32 %v951_v20, %v807_v29 }
 0x372   : > { %v1112_v22 = vmul.f32 -1.442695, %v879_v14 }
 0x373   : > { %v1113_v24 = vmul.f32 -1.442695, %v881_v21  ;;  %v1114_v35 = vmul.f32 -1.442695, %v952_v30 }
 0x374   : > { %1435 = vpow2.f32 %v1112_v22 }
 0x375   : > { %1437 = vpow2.f32 %v1113_v24 }
 0x376   : > { %1439 = vpow2.f32 %v1114_v35 }
 0x377   : > { %1441 = vtanh.f32 %v950_v36 }
 0x37e   : > { %v1436_v37 = vpop.eup %1435 }
 0x37f   : > { %v1438_v39 = vpop.eup %1437  ;;  %v957_v44 = vadd.f32 1.0, %v1436_v37 }
 0x380   : > { %v963_v58 = vadd.f32 1.0, %v1438_v39  ;;  %v1440_v45 = vpop.eup %1439 }
 0x381   : > { %1443 = vrcp.f32 %v957_v44  ;;  %v1442_v48 = vpop.eup %1441  ;;  %v970_v57 = vadd.f32 1.0, %v1440_v45 }
 0x382   : > { %1445 = vrcp.f32 %v963_v58 }
 0x383   : > { %1447 = vrcp.f32 %v970_v57 }
 0x38b   : > { %v1444_v51 = vpop.eup %1443 }
 0x38c   : > { %v1446_v52 = vpop.eup %1445  ;;  %v974_v54 = vmul.f32 %v1444_v51, %v1442_v48 }
 0x38d   : > { %v973_v60 = vmul.f32 %v1446_v52, %v723_v55  ;;  %v1448_v8 = vpop.eup %1447 }
 0x38f   : > { %v975_v61 = vadd.f32 %v974_v54, %v973_v60 }
 0x391   : > { %1449 = vtanh.f32 %v975_v61  ;;  %978 = vst [vmem:[#allocation3] sm:$0x3] %v975_v61 }
 0x39b   : > { %v1450_v9 = vpop.eup %1449 }
 0x39c   : > { %v977_v10 = vmul.f32 %v1450_v9, %v1448_v8 }
 0x39e   : > { %979 = vst [vmem:[#allocation2] sm:$0x3] %v977_v10  ;;  %1115 = vst [vmem:[%s1784_s30 + $0x4] sm:$0x3] %v977_v10 }
 0x39f   : > { %1522 = shalt.err (!%p1519_p9)
}
 0x3a0   : > { %s1523_s4 = scalar_lea.hbm %s1971_s6, 96  ;;  %s1527_s15 = scalar_lea.hbm %s2024_s2, 288 }
 0x3a1   : > { %p1524_p1 = scmp.ne.s32.totalorder %s1971_s6, %s1523_s4  ;;  %p1528_p7 = scmp.lt.u32.totalorder %s1971_s6, %s2024_s2 }
 0x3a2   : > { %p1529_p10 = scmp.lt.u32.totalorder %s1527_s15, %s1523_s4  ;;  %p1531_p6 = scmp.lt.u32.totalorder %s1523_s4, %s1971_s6 }
 0x3a3   : > { %p1525_p2 = pnand %p1524_p1, %p1715_p11 }
 0x3a4   : > { %p1530_p4 = por %p1529_p10, %p1528_p7 }
 0x3a5   : > { %p1526_p3 = pneg %p1525_p2 }
 0x3a6   : > { %p1532_p8 = por %p1531_p6, %p1530_p4 }
 0x3a8   : > { %p1533_p12 = pnand %p1532_p8, %p1526_p3 }
 0x3aa   : > { %1536 = shalt.err (!%p1533_p12)
}
 0x3ab   : > { %s1607_s21 = smov 32   ;;  %s1608_s30 = smov 2  }
 0x3ac   : > { %1324 = dma.vmem_to_hbm [thread:$0]  (%p1715_p11), %s1973_s19, 96, %s1971_s6, %s983_s27, %s1607_s21, %s1607_s21, %s1608_s30  }
 0x3ad PF: > { %p1341_p13 = scmp.ge.s32.totalorder %s1595_s14, 2  ;;  %s1012_s17 = sand.u32 1, %s1575_s9  }
 0x3ae   : > { %p2041_p0 = scmp.ne.s32.totalorder %s2032_s20, 0  ;;  %s1013_s3 = scalar_lea.sflag [#allocation6], %s1012_s17 }
 0x3b0   : > { %p1335_p5 = pnand %p1341_p13, %p2041_p0 }
 0x3b2   : > { %1570 = dma.done.wait (!%p1335_p5), %s1013_s3, 96  }
 0x3b3   : > { %1572 = vsyncadd (!%p1335_p5), %s1013_s3, 4294967200  ;;  %s19_s14 = sadd.s32 1, %s1595_s14   ;;  %s2042_s9 = smov %s1579_s10 }
 0x3b4   : > { %p16_p9 = scmp.ge.s32.totalorder %s19_s14, 5   ;;  %s2043_s10 = smov %s1583_s11 }
 0x3b5   : > { %s2044_s11 = smov %s1724_s28  ;;  %s2045_s12 = smov %s1591_s13 }
 0x3b6   : > { %s2046_s13 = smov %s2048_s25  ;;  %18 = sbr.rel (!%p16_p9) target bundleno = 7 (0x7), region = 85 }
 0x3bd   :  { %1018 = vsyncpa [#allocation5], 1 }
 0x3be   :  { %1020 = vsyncpa [#allocation5 + $0x1], 1 }
 0x3bf   :  { %1021 = vsyncpa [#allocation8], 1 }
 0x3c0   :  { %1022 = vsyncpa [#allocation6], 1 }
 0x3c1   :  { %1024 = vsyncpa [#allocation6 + $0x1], 1 }

</bundles_post_ra>
